<compile_context>
chip_gen: v7x
topology: tpu7x:2x2x1
jax: 0.10.0
libtpu: 0.0.40
codegen_flags: <defaults>
</compile_context>

<pallas_src>
import functools

import numpy as np

import jax
import jax.numpy as jnp
from jax.experimental import pallas as pl
from jax.experimental.pallas import tpu as pltpu

BN_EPS = 1e-5
CP = 128                      # channel dim padded to one full lane width
MXU_DTYPE = jnp.bfloat16      # matmul operand dtype (f32 accumulation)


def _vmem_spec():
    return pl.BlockSpec(memory_space=pltpu.MemorySpace.VMEM)


# ---------------------------------------------------------------------------
# The single fused kernel
# ---------------------------------------------------------------------------

def _resnet_fused_kernel(p1_ref, w1_ref, g1_ref, b1_ref,
                         s_ref, wa_ref, ga_ref, ba_ref,
                         wb_ref, gb_ref, bb_ref,
                         avg_ref, wl_ref, bl_ref,
                         out_ref, *, r2):
    """Fused ResNet forward.  r2 = N * H_pool * W_pool (rows after max-pool)."""

    def batchnorm(y, g, b):
        # Training-mode BN over the full (N*H*W) row domain, single pass:
        # var = E[y^2] - E[y]^2 (biased, like PyTorch's normalization).
        inv_cnt = 1.0 / float(y.shape[0])
        mean = jnp.sum(y, axis=0, keepdims=True) * inv_cnt
        ex2 = jnp.sum(y * y, axis=0, keepdims=True) * inv_cnt
        var = jnp.maximum(ex2 - mean * mean, 0.0)
        return (y - mean) * (jax.lax.rsqrt(var + BN_EPS) * g) + b

    def conv3x3_same(act, wcat_ref):
        # 3x3 / stride 1 / pad 1 conv on the flattened (r2, CP) activation.
        # One wide MXU matmul mixes channels for all nine taps at once:
        #   zcat[:, t*CP:(t+1)*CP] = act @ W_t
        zcat = jnp.dot(act.astype(MXU_DTYPE), wcat_ref[...],
                       preferred_element_type=jnp.float32).astype(MXU_DTYPE)
        # Nine tiny 0/1 shift matmuls place each tap's contribution at the
        # spatially shifted destination rows (rows whose tap lands in the
        # zero-padding ring stay zero).  Matmul associativity guarantees
        #   sum_t S_t @ (act @ W_t) == sum_t (S_t @ act) @ W_t == conv(act).
        acc = jnp.dot(s_ref[0], zcat[:, 0:CP],
                      preferred_element_type=jnp.float32)
        for t in range(1, 9):
            acc = acc + jnp.dot(s_ref[t], zcat[:, t * CP:(t + 1) * CP],
                                preferred_element_type=jnp.float32)
        return acc

    # conv1 (3x3 / stride 2 / pad 1, as an im2col matmul) + BN1 + ReLU.
    y1 = jnp.dot(p1_ref[...], w1_ref[...], preferred_element_type=jnp.float32)
    y1 = jnp.maximum(batchnorm(y1, g1_ref[...], b1_ref[...]), 0.0)

    # MaxPool2d(2): conv1 rows arrive ordered (ph, pw, n, oh, ow), so the four
    # pooling-window members are four contiguous, tile-aligned row slabs ->
    # elementwise max entirely in VMEM, fused with conv1.
    x_blk = jnp.maximum(jnp.maximum(y1[0:r2], y1[r2:2 * r2]),
                        jnp.maximum(y1[2 * r2:3 * r2], y1[3 * r2:4 * r2]))

    # Block: relu(x + bn(conv(relu(bn(conv(x)))))).
    ya = jnp.maximum(batchnorm(conv3x3_same(x_blk, wa_ref),
                               ga_ref[...], ba_ref[...]), 0.0)
    yb = batchnorm(conv3x3_same(ya, wb_ref), gb_ref[...], bb_ref[...])
    yo = jnp.maximum(yb + x_blk, 0.0)

    # AdaptiveAvgPool2d(1) as an (N, r2) averaging matmul, fused with the
    # Linear head.  The class dim is padded to 128 lanes -> unmasked store.
    pooled = jnp.dot(avg_ref[...], yo, preferred_element_type=jnp.float32)
    out_ref[...] = (jnp.dot(pooled, wl_ref[...],
                            preferred_element_type=jnp.float32) + bl_ref[...])


# ---------------------------------------------------------------------------
# Wrapper-side (trace-time) preparation: tiny im2col for conv1, constant shift
# and averaging matrices, channel padding / repacking of the parameters.
# ---------------------------------------------------------------------------

def _conv1_patches(x_nhwc, ksize=3, stride=2, pad=1):
    """im2col for conv1 only (Cin=1, a few KB).  Rows are emitted in
    (ph, pw, n, oh_pooled, ow_pooled) order so the subsequent 2x2 max-pool is
    a max over four contiguous row slabs inside the kernel."""
    n, h, w, cin = x_nhwc.shape
    ho = (h + 2 * pad - ksize) // stride + 1
    wo = (w + 2 * pad - ksize) // stride + 1
    assert ho % 2 == 0 and wo % 2 == 0, "fused maxpool(2) expects even conv1 output"
    hp, wp = ho // 2, wo // 2
    xp = jnp.pad(x_nhwc, ((0, 0), (pad, pad), (pad, pad), (0, 0)))
    taps = [xp[:, dh:dh + stride * ho:stride, dw:dw + stride * wo:stride, :]
            for dh in range(ksize) for dw in range(ksize)]
    p = jnp.concatenate(taps, axis=-1)                       # (n, ho, wo, 9*cin)
    p = p.reshape(n, hp, 2, wp, 2, ksize * ksize * cin)      # (n, ohp, ph, owp, pw, k)
    p = jnp.transpose(p, (2, 4, 0, 1, 3, 5))                 # (ph, pw, n, ohp, owp, k)
    return p.reshape(4 * n * hp * wp, ksize * ksize * cin), (n, hp, wp)


def _shift_matrices(n, hp, wp):
    """S[t, dest_row, src_row] = 1 for the 3x3/stride-1/pad-1 spatial gather."""
    r = n * hp * wp
    s = np.zeros((9, r, r), np.float32)
    t = 0
    for dh in range(3):
        for dw in range(3):
            dy, dx = dh - 1, dw - 1
            for i in range(n):
                for oh in range(hp):
                    for ow in range(wp):
                        sh, sw = oh + dy, ow + dx
                        if 0 <= sh < hp and 0 <= sw < wp:
                            s[t, (i * hp + oh) * wp + ow,
                              (i * hp + sh) * wp + sw] = 1.0
            t += 1
    return s


def _avg_matrix(n, hp, wp):
    r = n * hp * wp
    a = np.zeros((n, r), np.float32)
    for i in range(n):
        a[i, i * hp * wp:(i + 1) * hp * wp] = 1.0 / (hp * wp)
    return a


def resnet_forward(params, x_nchw):
    # PyTorch NCHW -> NHWC once at the boundary.
    x = jnp.transpose(x_nchw, (0, 2, 3, 1)).astype(jnp.float32)
    patches1, (n, hp, wp) = _conv1_patches(x)
    r1, r2 = patches1.shape[0], n * hp * wp

    c = params["bn1_g"].shape[0]
    nc = params["lin_b"].shape[0]
    ncp = ((nc + CP - 1) // CP) * CP            # lane-dense padded class dim

    def pad_axis(v, axis, target):
        widths = [(0, 0)] * v.ndim
        widths[axis] = (0, target - v.shape[axis])
        return jnp.pad(v, widths)

    def bn_vec(v):                        # (C,) -> (1, CP) f32, zero-padded
        return pad_axis(v.reshape(1, c), 1, CP).astype(jnp.float32)

    def conv_taps_wide(w_hwio):
        # (3,3,C,C) HWIO -> lane-dense (CP, 9*CP) slab with
        # wcat[cin, t*CP + cout] = w[kh, kw, cin, cout], t = kh*3 + kw.
        w9 = pad_axis(pad_axis(w_hwio, 2, CP), 3, CP).reshape(9, CP, CP)
        return jnp.transpose(w9, (1, 0, 2)).reshape(CP, 9 * CP).astype(MXU_DTYPE)

    # Parameter repacking (tiny; folded under jit): channel dim padded to the
    # full 128-lane width, conv taps concatenated into one lane-dense slab,
    # MXU operands pre-cast to bf16.  Zero padding keeps the padded channels
    # exactly zero through conv / BN / ReLU, so the math is unchanged.
    w1 = pad_axis(params["conv1_w"].reshape(9, c), 1, CP).astype(MXU_DTYPE)    # (9, CP)
    wa = conv_taps_wide(params["blk_wa"])                                      # (CP, 9*CP)
    wb = conv_taps_wide(params["blk_wb"])                                      # (CP, 9*CP)
    wl = pad_axis(pad_axis(params["lin_w"], 0, CP), 1, ncp).astype(jnp.float32)
    bl = pad_axis(params["lin_b"].reshape(1, nc), 1, ncp).astype(jnp.float32)

    operands = (
        patches1.astype(MXU_DTYPE),                                   # (r1, 9)
        w1, bn_vec(params["bn1_g"]), bn_vec(params["bn1_b"]),
        jnp.asarray(_shift_matrices(n, hp, wp), dtype=MXU_DTYPE),     # (9, r2, r2)
        wa, bn_vec(params["blk_ga"]), bn_vec(params["blk_ba"]),
        wb, bn_vec(params["blk_gb"]), bn_vec(params["blk_bb"]),
        jnp.asarray(_avg_matrix(n, hp, wp), dtype=jnp.float32),       # (n, r2)
        wl, bl,
    )

    flops = (2 * r1 * 9 * CP                                  # conv1 matmul
             + 2 * (2 * r2 * CP * 9 * CP                      # wide tap matmul x2
                    + 9 * 2 * r2 * r2 * CP)                   # shift matmuls x2
             + 2 * n * r2 * CP + 2 * n * CP * ncp)            # avg pool + linear
    bytes_accessed = sum(int(np.prod(a.shape)) * a.dtype.itemsize
                         for a in operands) + n * ncp * 4

    kernel = functools.partial(_resnet_fused_kernel, r2=r2)
    logits = pl.pallas_call(
        kernel,
        out_shape=jax.ShapeDtypeStruct((n, ncp), jnp.float32),
        in_specs=[_vmem_spec()] * len(operands),
        out_specs=_vmem_spec(),
        cost_estimate=pl.CostEstimate(flops=int(flops),
                                      transcendentals=4 * CP,
                                      bytes_accessed=int(bytes_accessed)),
    )(*operands)
    return logits[:, :nc]


# ---------------------------------------------------------------------------
# Parameters (same pytree layout as before) and a pure-XLA reference with
# identical training-mode-BN semantics.
# ---------------------------------------------------------------------------

def init_params(key, num_channels=4, num_classes=10):
    c = num_channels
    ks = jax.random.split(key, 8)
    return {
        # conv weights in HWIO layout (kh, kw, cin, cout)
        "conv1_w": 0.2 * jax.random.normal(ks[0], (3, 3, 1, c), jnp.float32),
        "bn1_g": jnp.ones((c,), jnp.float32)
                 + 0.1 * jax.random.normal(ks[1], (c,), jnp.float32),
        "bn1_b": 0.1 * jax.random.normal(ks[2], (c,), jnp.float32),
        "blk_wa": 0.2 * jax.random.normal(ks[3], (3, 3, c, c), jnp.float32),
        "blk_ga": jnp.ones((c,), jnp.float32),
        "blk_ba": jnp.zeros((c,), jnp.float32),
        "blk_wb": 0.2 * jax.random.normal(ks[4], (3, 3, c, c), jnp.float32),
        "blk_gb": jnp.ones((c,), jnp.float32),
        "blk_bb": jnp.zeros((c,), jnp.float32),
        # nn.Linear(c, num_classes): stored directly as (c, num_classes) = weight.T
        "lin_w": 0.2 * jax.random.normal(ks[5], (c, num_classes), jnp.float32),
        "lin_b": 0.1 * jax.random.normal(ks[6], (num_classes,), jnp.float32),
    }


def _reference_forward(params, x_nchw):
    """Pure-XLA reference (f32) with identical training-mode BN semantics."""
    x = jnp.transpose(x_nchw, (0, 2, 3, 1)).astype(jnp.float32)

    def conv(v, w_hwio, stride):
        return jax.lax.conv_general_dilated(
            v, w_hwio, window_strides=(stride, stride), padding=((1, 1), (1, 1)),
            dimension_numbers=("NHWC", "HWIO", "NHWC"))

    def bn(v, g, b):
        mean = jnp.mean(v, axis=(0, 1, 2), keepdims=True)
        var = jnp.mean((v - mean) ** 2, axis=(0, 1, 2), keepdims=True)
        return (v - mean) * jax.lax.rsqrt(var + BN_EPS) * g + b

    y = jax.nn.relu(bn(conv(x, params["conv1_w"], 2),
                       params["bn1_g"], params["bn1_b"]))
    nb, ho, wo, cc = y.shape
    y = y.reshape(nb, ho // 2, 2, wo // 2, 2, cc).max(axis=(2, 4))   # MaxPool2d(2)
    z = jax.nn.relu(bn(conv(y, params["blk_wa"], 1),
                       params["blk_ga"], params["blk_ba"]))
    z = bn(conv(z, params["blk_wb"], 1), params["blk_gb"], params["blk_bb"])
    y = jax.nn.relu(y + z)
    pooled = jnp.mean(y, axis=(1, 2))                                # AdaptiveAvgPool2d(1)
    return pooled @ params["lin_w"] + params["lin_b"]


if __name__ == "__main__":
    num_channels, num_classes = 4, 10
    key = jax.random.PRNGKey(0)
    pkey, xkey = jax.random.split(key)

    params = init_params(pkey, num_channels, num_classes)
    x = jax.random.normal(xkey, (2, 1, 16, 16), jnp.float32)   # (N, 1, H, W) like PyTorch

    out = jax.jit(resnet_forward)(params, x)
    out = jax.block_until_ready(out)

    assert out.shape == (2, num_classes), out.shape
    assert out.dtype == jnp.float32
    assert bool(jnp.all(jnp.isfinite(out)))

    # Numerical check against a pure-XLA f32 reference (the kernel uses bf16 MXU
    # operands, hence the loose tolerance).
    ref = _reference_forward(params, x)
    assert bool(jnp.allclose(out, ref, atol=2e-1, rtol=2e-1)), (
        "max abs diff = %f" % float(jnp.max(jnp.abs(out - ref))))

    print("KERNEL_OK")
</pallas_src>

<mosaic_0001>
module attributes {stable_mosaic.version = 11 : i64} {
  func.func @_resnet_fused_kernel(%arg0: memref<128x9xbf16, #tpu.memory_space<vmem>>, %arg1: memref<9x128xbf16, #tpu.memory_space<vmem>>, %arg2: memref<1x128xf32, #tpu.memory_space<vmem>>, %arg3: memref<1x128xf32, #tpu.memory_space<vmem>>, %arg4: memref<9x32x32xbf16, #tpu.memory_space<vmem>>, %arg5: memref<128x1152xbf16, #tpu.memory_space<vmem>>, %arg6: memref<1x128xf32, #tpu.memory_space<vmem>>, %arg7: memref<1x128xf32, #tpu.memory_space<vmem>>, %arg8: memref<128x1152xbf16, #tpu.memory_space<vmem>>, %arg9: memref<1x128xf32, #tpu.memory_space<vmem>>, %arg10: memref<1x128xf32, #tpu.memory_space<vmem>>, %arg11: memref<2x32xf32, #tpu.memory_space<vmem>>, %arg12: memref<128x128xf32, #tpu.memory_space<vmem>>, %arg13: memref<1x128xf32, #tpu.memory_space<vmem>>, %arg14: memref<2x128xf32, #tpu.memory_space<vmem>>) attributes {dimension_semantics = [], scalar_prefetch = 0 : i64, scratch_operands = 0 : i64, tpu.core_type = #tpu.core_type<tc>} {
    %c0 = arith.constant 0 : index
    %c0_0 = arith.constant 0 : index
    %0 = vector.load %arg0[%c0, %c0_0] : memref<128x9xbf16, #tpu.memory_space<vmem>>, vector<128x9xbf16>
    %c0_1 = arith.constant 0 : index
    %c0_2 = arith.constant 0 : index
    %1 = vector.load %arg1[%c0_1, %c0_2] : memref<9x128xbf16, #tpu.memory_space<vmem>>, vector<9x128xbf16>
    %cst = arith.constant dense<0.000000e+00> : vector<128x128xf32>
    %2 = tpu.matmul %0, %1, %cst {dimension_numbers = #tpu.dot_dimension_numbers<[1], [0], [0], [1], [0, 0, 1, 1], [], []>} : vector<128x9xbf16>, vector<9x128xbf16>, vector<128x128xf32> -> vector<128x128xf32>
    %c0_3 = arith.constant 0 : index
    %c0_4 = arith.constant 0 : index
    %3 = vector.load %arg2[%c0_3, %c0_4] : memref<1x128xf32, #tpu.memory_space<vmem>>, vector<1x128xf32>
    %c0_5 = arith.constant 0 : index
    %c0_6 = arith.constant 0 : index
    %4 = vector.load %arg3[%c0_5, %c0_6] : memref<1x128xf32, #tpu.memory_space<vmem>>, vector<1x128xf32>
    %cst_7 = arith.constant dense<0.000000e+00> : vector<128xf32>
    %5 = vector.multi_reduction <add>, %2, %cst_7 [0] : vector<128x128xf32> to vector<128xf32>
    %6 = vector.shape_cast %5 : vector<128xf32> to vector<1x128xf32>
    %cst_8 = arith.constant 7.812500e-03 : f32
    %7 = vector.broadcast %cst_8 : f32 to vector<1x128xf32>
    %8 = arith.mulf %6, %7 : vector<1x128xf32>
    %9 = arith.mulf %2, %2 : vector<128x128xf32>
    %cst_9 = arith.constant dense<0.000000e+00> : vector<128xf32>
    %10 = vector.multi_reduction <add>, %9, %cst_9 [0] : vector<128x128xf32> to vector<128xf32>
    %11 = vector.shape_cast %10 : vector<128xf32> to vector<1x128xf32>
    %cst_10 = arith.constant 7.812500e-03 : f32
    %12 = vector.broadcast %cst_10 : f32 to vector<1x128xf32>
    %13 = arith.mulf %11, %12 : vector<1x128xf32>
    %14 = arith.mulf %8, %8 : vector<1x128xf32>
    %15 = arith.subf %13, %14 : vector<1x128xf32>
    %cst_11 = arith.constant 0.000000e+00 : f32
    %16 = vector.broadcast %cst_11 : f32 to vector<1x128xf32>
    %17 = arith.maximumf %15, %16 : vector<1x128xf32>
    %18 = vector.broadcast %8 : vector<1x128xf32> to vector<128x128xf32>
    %19 = arith.subf %2, %18 : vector<128x128xf32>
    %cst_12 = arith.constant 9.99999974E-6 : f32
    %20 = vector.broadcast %cst_12 : f32 to vector<1x128xf32>
    %21 = arith.addf %17, %20 : vector<1x128xf32>
    %22 = math.rsqrt %21 : vector<1x128xf32>
    %23 = arith.mulf %22, %3 : vector<1x128xf32>
    %24 = vector.broadcast %23 : vector<1x128xf32> to vector<128x128xf32>
    %25 = arith.mulf %19, %24 : vector<128x128xf32>
    %26 = vector.broadcast %4 : vector<1x128xf32> to vector<128x128xf32>
    %27 = arith.addf %25, %26 : vector<128x128xf32>
    %cst_13 = arith.constant 0.000000e+00 : f32
    %28 = vector.broadcast %cst_13 : f32 to vector<128x128xf32>
    %29 = arith.maximumf %27, %28 : vector<128x128xf32>
    %30 = vector.extract_strided_slice %29 {offsets = [0, 0], sizes = [32, 128], strides = [1, 1]} : vector<128x128xf32> to vector<32x128xf32>
    %31 = vector.extract_strided_slice %29 {offsets = [32, 0], sizes = [32, 128], strides = [1, 1]} : vector<128x128xf32> to vector<32x128xf32>
    %32 = arith.maximumf %30, %31 : vector<32x128xf32>
    %33 = vector.extract_strided_slice %29 {offsets = [64, 0], sizes = [32, 128], strides = [1, 1]} : vector<128x128xf32> to vector<32x128xf32>
    %34 = vector.extract_strided_slice %29 {offsets = [96, 0], sizes = [32, 128], strides = [1, 1]} : vector<128x128xf32> to vector<32x128xf32>
    %35 = arith.maximumf %33, %34 : vector<32x128xf32>
    %36 = arith.maximumf %32, %35 : vector<32x128xf32>
    %37 = arith.truncf %36 : vector<32x128xf32> to vector<32x128xbf16>
    %c0_14 = arith.constant 0 : index
    %c0_15 = arith.constant 0 : index
    %38 = vector.load %arg5[%c0_14, %c0_15] : memref<128x1152xbf16, #tpu.memory_space<vmem>>, vector<128x1152xbf16>
    %cst_16 = arith.constant dense<0.000000e+00> : vector<32x1152xf32>
    %39 = tpu.matmul %37, %38, %cst_16 {dimension_numbers = #tpu.dot_dimension_numbers<[1], [0], [0], [1], [0, 0, 1, 1], [], []>} : vector<32x128xbf16>, vector<128x1152xbf16>, vector<32x1152xf32> -> vector<32x1152xf32>
    %40 = arith.truncf %39 : vector<32x1152xf32> to vector<32x1152xbf16>
    %c0_17 = arith.constant 0 : index
    %c0_18 = arith.constant 0 : index
    %c0_19 = arith.constant 0 : index
    %41 = vector.load %arg4[%c0_17, %c0_18, %c0_19] : memref<9x32x32xbf16, #tpu.memory_space<vmem>>, vector<1x32x32xbf16>
    %42 = vector.shape_cast %41 : vector<1x32x32xbf16> to vector<32x32xbf16>
    %43 = vector.extract_strided_slice %40 {offsets = [0, 0], sizes = [32, 128], strides = [1, 1]} : vector<32x1152xbf16> to vector<32x128xbf16>
    %cst_20 = arith.constant dense<0.000000e+00> : vector<32x128xf32>
    %44 = tpu.matmul %42, %43, %cst_20 {dimension_numbers = #tpu.dot_dimension_numbers<[1], [0], [0], [1], [0, 0, 1, 1], [], []>} : vector<32x32xbf16>, vector<32x128xbf16>, vector<32x128xf32> -> vector<32x128xf32>
    %c1 = arith.constant 1 : index
    %c0_21 = arith.constant 0 : index
    %c0_22 = arith.constant 0 : index
    %45 = vector.load %arg4[%c1, %c0_21, %c0_22] : memref<9x32x32xbf16, #tpu.memory_space<vmem>>, vector<1x32x32xbf16>
    %46 = vector.shape_cast %45 : vector<1x32x32xbf16> to vector<32x32xbf16>
    %47 = vector.extract_strided_slice %40 {offsets = [0, 128], sizes = [32, 128], strides = [1, 1]} : vector<32x1152xbf16> to vector<32x128xbf16>
    %cst_23 = arith.constant dense<0.000000e+00> : vector<32x128xf32>
    %48 = tpu.matmul %46, %47, %cst_23 {dimension_numbers = #tpu.dot_dimension_numbers<[1], [0], [0], [1], [0, 0, 1, 1], [], []>} : vector<32x32xbf16>, vector<32x128xbf16>, vector<32x128xf32> -> vector<32x128xf32>
    %49 = arith.addf %44, %48 : vector<32x128xf32>
    %c2 = arith.constant 2 : index
    %c0_24 = arith.constant 0 : index
    %c0_25 = arith.constant 0 : index
    %50 = vector.load %arg4[%c2, %c0_24, %c0_25] : memref<9x32x32xbf16, #tpu.memory_space<vmem>>, vector<1x32x32xbf16>
    %51 = vector.shape_cast %50 : vector<1x32x32xbf16> to vector<32x32xbf16>
    %52 = vector.extract_strided_slice %40 {offsets = [0, 256], sizes = [32, 128], strides = [1, 1]} : vector<32x1152xbf16> to vector<32x128xbf16>
    %cst_26 = arith.constant dense<0.000000e+00> : vector<32x128xf32>
    %53 = tpu.matmul %51, %52, %cst_26 {dimension_numbers = #tpu.dot_dimension_numbers<[1], [0], [0], [1], [0, 0, 1, 1], [], []>} : vector<32x32xbf16>, vector<32x128xbf16>, vector<32x128xf32> -> vector<32x128xf32>
    %54 = arith.addf %49, %53 : vector<32x128xf32>
    %c3 = arith.constant 3 : index
    %c0_27 = arith.constant 0 : index
    %c0_28 = arith.constant 0 : index
    %55 = vector.load %arg4[%c3, %c0_27, %c0_28] : memref<9x32x32xbf16, #tpu.memory_space<vmem>>, vector<1x32x32xbf16>
    %56 = vector.shape_cast %55 : vector<1x32x32xbf16> to vector<32x32xbf16>
    %57 = vector.extract_strided_slice %40 {offsets = [0, 384], sizes = [32, 128], strides = [1, 1]} : vector<32x1152xbf16> to vector<32x128xbf16>
    %cst_29 = arith.constant dense<0.000000e+00> : vector<32x128xf32>
    %58 = tpu.matmul %56, %57, %cst_29 {dimension_numbers = #tpu.dot_dimension_numbers<[1], [0], [0], [1], [0, 0, 1, 1], [], []>} : vector<32x32xbf16>, vector<32x128xbf16>, vector<32x128xf32> -> vector<32x128xf32>
    %59 = arith.addf %54, %58 : vector<32x128xf32>
    %c4 = arith.constant 4 : index
    %c0_30 = arith.constant 0 : index
    %c0_31 = arith.constant 0 : index
    %60 = vector.load %arg4[%c4, %c0_30, %c0_31] : memref<9x32x32xbf16, #tpu.memory_space<vmem>>, vector<1x32x32xbf16>
    %61 = vector.shape_cast %60 : vector<1x32x32xbf16> to vector<32x32xbf16>
    %62 = vector.extract_strided_slice %40 {offsets = [0, 512], sizes = [32, 128], strides = [1, 1]} : vector<32x1152xbf16> to vector<32x128xbf16>
    %cst_32 = arith.constant dense<0.000000e+00> : vector<32x128xf32>
    %63 = tpu.matmul %61, %62, %cst_32 {dimension_numbers = #tpu.dot_dimension_numbers<[1], [0], [0], [1], [0, 0, 1, 1], [], []>} : vector<32x32xbf16>, vector<32x128xbf16>, vector<32x128xf32> -> vector<32x128xf32>
    %64 = arith.addf %59, %63 : vector<32x128xf32>
    %c5 = arith.constant 5 : index
    %c0_33 = arith.constant 0 : index
    %c0_34 = arith.constant 0 : index
    %65 = vector.load %arg4[%c5, %c0_33, %c0_34] : memref<9x32x32xbf16, #tpu.memory_space<vmem>>, vector<1x32x32xbf16>
    %66 = vector.shape_cast %65 : vector<1x32x32xbf16> to vector<32x32xbf16>
    %67 = vector.extract_strided_slice %40 {offsets = [0, 640], sizes = [32, 128], strides = [1, 1]} : vector<32x1152xbf16> to vector<32x128xbf16>
    %cst_35 = arith.constant dense<0.000000e+00> : vector<32x128xf32>
    %68 = tpu.matmul %66, %67, %cst_35 {dimension_numbers = #tpu.dot_dimension_numbers<[1], [0], [0], [1], [0, 0, 1, 1], [], []>} : vector<32x32xbf16>, vector<32x128xbf16>, vector<32x128xf32> -> vector<32x128xf32>
    %69 = arith.addf %64, %68 : vector<32x128xf32>
    %c6 = arith.constant 6 : index
    %c0_36 = arith.constant 0 : index
    %c0_37 = arith.constant 0 : index
    %70 = vector.load %arg4[%c6, %c0_36, %c0_37] : memref<9x32x32xbf16, #tpu.memory_space<vmem>>, vector<1x32x32xbf16>
    %71 = vector.shape_cast %70 : vector<1x32x32xbf16> to vector<32x32xbf16>
    %72 = vector.extract_strided_slice %40 {offsets = [0, 768], sizes = [32, 128], strides = [1, 1]} : vector<32x1152xbf16> to vector<32x128xbf16>
    %cst_38 = arith.constant dense<0.000000e+00> : vector<32x128xf32>
    %73 = tpu.matmul %71, %72, %cst_38 {dimension_numbers = #tpu.dot_dimension_numbers<[1], [0], [0], [1], [0, 0, 1, 1], [], []>} : vector<32x32xbf16>, vector<32x128xbf16>, vector<32x128xf32> -> vector<32x128xf32>
    %74 = arith.addf %69, %73 : vector<32x128xf32>
    %c7 = arith.constant 7 : index
    %c0_39 = arith.constant 0 : index
    %c0_40 = arith.constant 0 : index
    %75 = vector.load %arg4[%c7, %c0_39, %c0_40] : memref<9x32x32xbf16, #tpu.memory_space<vmem>>, vector<1x32x32xbf16>
    %76 = vector.shape_cast %75 : vector<1x32x32xbf16> to vector<32x32xbf16>
    %77 = vector.extract_strided_slice %40 {offsets = [0, 896], sizes = [32, 128], strides = [1, 1]} : vector<32x1152xbf16> to vector<32x128xbf16>
    %cst_41 = arith.constant dense<0.000000e+00> : vector<32x128xf32>
    %78 = tpu.matmul %76, %77, %cst_41 {dimension_numbers = #tpu.dot_dimension_numbers<[1], [0], [0], [1], [0, 0, 1, 1], [], []>} : vector<32x32xbf16>, vector<32x128xbf16>, vector<32x128xf32> -> vector<32x128xf32>
    %79 = arith.addf %74, %78 : vector<32x128xf32>
    %c8 = arith.constant 8 : index
    %c0_42 = arith.constant 0 : index
    %c0_43 = arith.constant 0 : index
    %80 = vector.load %arg4[%c8, %c0_42, %c0_43] : memref<9x32x32xbf16, #tpu.memory_space<vmem>>, vector<1x32x32xbf16>
    %81 = vector.shape_cast %80 : vector<1x32x32xbf16> to vector<32x32xbf16>
    %82 = vector.extract_strided_slice %40 {offsets = [0, 1024], sizes = [32, 128], strides = [1, 1]} : vector<32x1152xbf16> to vector<32x128xbf16>
    %cst_44 = arith.constant dense<0.000000e+00> : vector<32x128xf32>
    %83 = tpu.matmul %81, %82, %cst_44 {dimension_numbers = #tpu.dot_dimension_numbers<[1], [0], [0], [1], [0, 0, 1, 1], [], []>} : vector<32x32xbf16>, vector<32x128xbf16>, vector<32x128xf32> -> vector<32x128xf32>
    %84 = arith.addf %79, %83 : vector<32x128xf32>
    %c0_45 = arith.constant 0 : index
    %c0_46 = arith.constant 0 : index
    %85 = vector.load %arg6[%c0_45, %c0_46] : memref<1x128xf32, #tpu.memory_space<vmem>>, vector<1x128xf32>
    %c0_47 = arith.constant 0 : index
    %c0_48 = arith.constant 0 : index
    %86 = vector.load %arg7[%c0_47, %c0_48] : memref<1x128xf32, #tpu.memory_space<vmem>>, vector<1x128xf32>
    %cst_49 = arith.constant dense<0.000000e+00> : vector<128xf32>
    %87 = vector.multi_reduction <add>, %84, %cst_49 [0] : vector<32x128xf32> to vector<128xf32>
    %88 = vector.shape_cast %87 : vector<128xf32> to vector<1x128xf32>
    %cst_50 = arith.constant 3.125000e-02 : f32
    %89 = vector.broadcast %cst_50 : f32 to vector<1x128xf32>
    %90 = arith.mulf %88, %89 : vector<1x128xf32>
    %91 = arith.mulf %84, %84 : vector<32x128xf32>
    %cst_51 = arith.constant dense<0.000000e+00> : vector<128xf32>
    %92 = vector.multi_reduction <add>, %91, %cst_51 [0] : vector<32x128xf32> to vector<128xf32>
    %93 = vector.shape_cast %92 : vector<128xf32> to vector<1x128xf32>
    %cst_52 = arith.constant 3.125000e-02 : f32
    %94 = vector.broadcast %cst_52 : f32 to vector<1x128xf32>
    %95 = arith.mulf %93, %94 : vector<1x128xf32>
    %96 = arith.mulf %90, %90 : vector<1x128xf32>
    %97 = arith.subf %95, %96 : vector<1x128xf32>
    %cst_53 = arith.constant 0.000000e+00 : f32
    %98 = vector.broadcast %cst_53 : f32 to vector<1x128xf32>
    %99 = arith.maximumf %97, %98 : vector<1x128xf32>
    %100 = vector.broadcast %90 : vector<1x128xf32> to vector<32x128xf32>
    %101 = arith.subf %84, %100 : vector<32x128xf32>
    %cst_54 = arith.constant 9.99999974E-6 : f32
    %102 = vector.broadcast %cst_54 : f32 to vector<1x128xf32>
    %103 = arith.addf %99, %102 : vector<1x128xf32>
    %104 = math.rsqrt %103 : vector<1x128xf32>
    %105 = arith.mulf %104, %85 : vector<1x128xf32>
    %106 = vector.broadcast %105 : vector<1x128xf32> to vector<32x128xf32>
    %107 = arith.mulf %101, %106 : vector<32x128xf32>
    %108 = vector.broadcast %86 : vector<1x128xf32> to vector<32x128xf32>
    %109 = arith.addf %107, %108 : vector<32x128xf32>
    %cst_55 = arith.constant 0.000000e+00 : f32
    %110 = vector.broadcast %cst_55 : f32 to vector<32x128xf32>
    %111 = arith.maximumf %109, %110 : vector<32x128xf32>
    %112 = arith.truncf %111 : vector<32x128xf32> to vector<32x128xbf16>
    %c0_56 = arith.constant 0 : index
    %c0_57 = arith.constant 0 : index
    %113 = vector.load %arg8[%c0_56, %c0_57] : memref<128x1152xbf16, #tpu.memory_space<vmem>>, vector<128x1152xbf16>
    %cst_58 = arith.constant dense<0.000000e+00> : vector<32x1152xf32>
    %114 = tpu.matmul %112, %113, %cst_58 {dimension_numbers = #tpu.dot_dimension_numbers<[1], [0], [0], [1], [0, 0, 1, 1], [], []>} : vector<32x128xbf16>, vector<128x1152xbf16>, vector<32x1152xf32> -> vector<32x1152xf32>
    %115 = arith.truncf %114 : vector<32x1152xf32> to vector<32x1152xbf16>
    %c0_59 = arith.constant 0 : index
    %c0_60 = arith.constant 0 : index
    %c0_61 = arith.constant 0 : index
    %116 = vector.load %arg4[%c0_59, %c0_60, %c0_61] : memref<9x32x32xbf16, #tpu.memory_space<vmem>>, vector<1x32x32xbf16>
    %117 = vector.shape_cast %116 : vector<1x32x32xbf16> to vector<32x32xbf16>
    %118 = vector.extract_strided_slice %115 {offsets = [0, 0], sizes = [32, 128], strides = [1, 1]} : vector<32x1152xbf16> to vector<32x128xbf16>
    %cst_62 = arith.constant dense<0.000000e+00> : vector<32x128xf32>
    %119 = tpu.matmul %117, %118, %cst_62 {dimension_numbers = #tpu.dot_dimension_numbers<[1], [0], [0], [1], [0, 0, 1, 1], [], []>} : vector<32x32xbf16>, vector<32x128xbf16>, vector<32x128xf32> -> vector<32x128xf32>
    %c1_63 = arith.constant 1 : index
    %c0_64 = arith.constant 0 : index
    %c0_65 = arith.constant 0 : index
    %120 = vector.load %arg4[%c1_63, %c0_64, %c0_65] : memref<9x32x32xbf16, #tpu.memory_space<vmem>>, vector<1x32x32xbf16>
    %121 = vector.shape_cast %120 : vector<1x32x32xbf16> to vector<32x32xbf16>
    %122 = vector.extract_strided_slice %115 {offsets = [0, 128], sizes = [32, 128], strides = [1, 1]} : vector<32x1152xbf16> to vector<32x128xbf16>
    %cst_66 = arith.constant dense<0.000000e+00> : vector<32x128xf32>
    %123 = tpu.matmul %121, %122, %cst_66 {dimension_numbers = #tpu.dot_dimension_numbers<[1], [0], [0], [1], [0, 0, 1, 1], [], []>} : vector<32x32xbf16>, vector<32x128xbf16>, vector<32x128xf32> -> vector<32x128xf32>
    %124 = arith.addf %119, %123 : vector<32x128xf32>
    %c2_67 = arith.constant 2 : index
    %c0_68 = arith.constant 0 : index
    %c0_69 = arith.constant 0 : index
    %125 = vector.load %arg4[%c2_67, %c0_68, %c0_69] : memref<9x32x32xbf16, #tpu.memory_space<vmem>>, vector<1x32x32xbf16>
    %126 = vector.shape_cast %125 : vector<1x32x32xbf16> to vector<32x32xbf16>
    %127 = vector.extract_strided_slice %115 {offsets = [0, 256], sizes = [32, 128], strides = [1, 1]} : vector<32x1152xbf16> to vector<32x128xbf16>
    %cst_70 = arith.constant dense<0.000000e+00> : vector<32x128xf32>
    %128 = tpu.matmul %126, %127, %cst_70 {dimension_numbers = #tpu.dot_dimension_numbers<[1], [0], [0], [1], [0, 0, 1, 1], [], []>} : vector<32x32xbf16>, vector<32x128xbf16>, vector<32x128xf32> -> vector<32x128xf32>
    %129 = arith.addf %124, %128 : vector<32x128xf32>
    %c3_71 = arith.constant 3 : index
    %c0_72 = arith.constant 0 : index
    %c0_73 = arith.constant 0 : index
    %130 = vector.load %arg4[%c3_71, %c0_72, %c0_73] : memref<9x32x32xbf16, #tpu.memory_space<vmem>>, vector<1x32x32xbf16>
    %131 = vector.shape_cast %130 : vector<1x32x32xbf16> to vector<32x32xbf16>
    %132 = vector.extract_strided_slice %115 {offsets = [0, 384], sizes = [32, 128], strides = [1, 1]} : vector<32x1152xbf16> to vector<32x128xbf16>
    %cst_74 = arith.constant dense<0.000000e+00> : vector<32x128xf32>
    %133 = tpu.matmul %131, %132, %cst_74 {dimension_numbers = #tpu.dot_dimension_numbers<[1], [0], [0], [1], [0, 0, 1, 1], [], []>} : vector<32x32xbf16>, vector<32x128xbf16>, vector<32x128xf32> -> vector<32x128xf32>
    %134 = arith.addf %129, %133 : vector<32x128xf32>
    %c4_75 = arith.constant 4 : index
    %c0_76 = arith.constant 0 : index
    %c0_77 = arith.constant 0 : index
    %135 = vector.load %arg4[%c4_75, %c0_76, %c0_77] : memref<9x32x32xbf16, #tpu.memory_space<vmem>>, vector<1x32x32xbf16>
    %136 = vector.shape_cast %135 : vector<1x32x32xbf16> to vector<32x32xbf16>
    %137 = vector.extract_strided_slice %115 {offsets = [0, 512], sizes = [32, 128], strides = [1, 1]} : vector<32x1152xbf16> to vector<32x128xbf16>
    %cst_78 = arith.constant dense<0.000000e+00> : vector<32x128xf32>
    %138 = tpu.matmul %136, %137, %cst_78 {dimension_numbers = #tpu.dot_dimension_numbers<[1], [0], [0], [1], [0, 0, 1, 1], [], []>} : vector<32x32xbf16>, vector<32x128xbf16>, vector<32x128xf32> -> vector<32x128xf32>
    %139 = arith.addf %134, %138 : vector<32x128xf32>
    %c5_79 = arith.constant 5 : index
    %c0_80 = arith.constant 0 : index
    %c0_81 = arith.constant 0 : index
    %140 = vector.load %arg4[%c5_79, %c0_80, %c0_81] : memref<9x32x32xbf16, #tpu.memory_space<vmem>>, vector<1x32x32xbf16>
    %141 = vector.shape_cast %140 : vector<1x32x32xbf16> to vector<32x32xbf16>
    %142 = vector.extract_strided_slice %115 {offsets = [0, 640], sizes = [32, 128], strides = [1, 1]} : vector<32x1152xbf16> to vector<32x128xbf16>
    %cst_82 = arith.constant dense<0.000000e+00> : vector<32x128xf32>
    %143 = tpu.matmul %141, %142, %cst_82 {dimension_numbers = #tpu.dot_dimension_numbers<[1], [0], [0], [1], [0, 0, 1, 1], [], []>} : vector<32x32xbf16>, vector<32x128xbf16>, vector<32x128xf32> -> vector<32x128xf32>
    %144 = arith.addf %139, %143 : vector<32x128xf32>
    %c6_83 = arith.constant 6 : index
    %c0_84 = arith.constant 0 : index
    %c0_85 = arith.constant 0 : index
    %145 = vector.load %arg4[%c6_83, %c0_84, %c0_85] : memref<9x32x32xbf16, #tpu.memory_space<vmem>>, vector<1x32x32xbf16>
    %146 = vector.shape_cast %145 : vector<1x32x32xbf16> to vector<32x32xbf16>
    %147 = vector.extract_strided_slice %115 {offsets = [0, 768], sizes = [32, 128], strides = [1, 1]} : vector<32x1152xbf16> to vector<32x128xbf16>
    %cst_86 = arith.constant dense<0.000000e+00> : vector<32x128xf32>
    %148 = tpu.matmul %146, %147, %cst_86 {dimension_numbers = #tpu.dot_dimension_numbers<[1], [0], [0], [1], [0, 0, 1, 1], [], []>} : vector<32x32xbf16>, vector<32x128xbf16>, vector<32x128xf32> -> vector<32x128xf32>
    %149 = arith.addf %144, %148 : vector<32x128xf32>
    %c7_87 = arith.constant 7 : index
    %c0_88 = arith.constant 0 : index
    %c0_89 = arith.constant 0 : index
    %150 = vector.load %arg4[%c7_87, %c0_88, %c0_89] : memref<9x32x32xbf16, #tpu.memory_space<vmem>>, vector<1x32x32xbf16>
    %151 = vector.shape_cast %150 : vector<1x32x32xbf16> to vector<32x32xbf16>
    %152 = vector.extract_strided_slice %115 {offsets = [0, 896], sizes = [32, 128], strides = [1, 1]} : vector<32x1152xbf16> to vector<32x128xbf16>
    %cst_90 = arith.constant dense<0.000000e+00> : vector<32x128xf32>
    %153 = tpu.matmul %151, %152, %cst_90 {dimension_numbers = #tpu.dot_dimension_numbers<[1], [0], [0], [1], [0, 0, 1, 1], [], []>} : vector<32x32xbf16>, vector<32x128xbf16>, vector<32x128xf32> -> vector<32x128xf32>
    %154 = arith.addf %149, %153 : vector<32x128xf32>
    %c8_91 = arith.constant 8 : index
    %c0_92 = arith.constant 0 : index
    %c0_93 = arith.constant 0 : index
    %155 = vector.load %arg4[%c8_91, %c0_92, %c0_93] : memref<9x32x32xbf16, #tpu.memory_space<vmem>>, vector<1x32x32xbf16>
    %156 = vector.shape_cast %155 : vector<1x32x32xbf16> to vector<32x32xbf16>
    %157 = vector.extract_strided_slice %115 {offsets = [0, 1024], sizes = [32, 128], strides = [1, 1]} : vector<32x1152xbf16> to vector<32x128xbf16>
    %cst_94 = arith.constant dense<0.000000e+00> : vector<32x128xf32>
    %158 = tpu.matmul %156, %157, %cst_94 {dimension_numbers = #tpu.dot_dimension_numbers<[1], [0], [0], [1], [0, 0, 1, 1], [], []>} : vector<32x32xbf16>, vector<32x128xbf16>, vector<32x128xf32> -> vector<32x128xf32>
    %159 = arith.addf %154, %158 : vector<32x128xf32>
    %c0_95 = arith.constant 0 : index
    %c0_96 = arith.constant 0 : index
    %160 = vector.load %arg9[%c0_95, %c0_96] : memref<1x128xf32, #tpu.memory_space<vmem>>, vector<1x128xf32>
    %c0_97 = arith.constant 0 : index
    %c0_98 = arith.constant 0 : index
    %161 = vector.load %arg10[%c0_97, %c0_98] : memref<1x128xf32, #tpu.memory_space<vmem>>, vector<1x128xf32>
    %cst_99 = arith.constant dense<0.000000e+00> : vector<128xf32>
    %162 = vector.multi_reduction <add>, %159, %cst_99 [0] : vector<32x128xf32> to vector<128xf32>
    %163 = vector.shape_cast %162 : vector<128xf32> to vector<1x128xf32>
    %cst_100 = arith.constant 3.125000e-02 : f32
    %164 = vector.broadcast %cst_100 : f32 to vector<1x128xf32>
    %165 = arith.mulf %163, %164 : vector<1x128xf32>
    %166 = arith.mulf %159, %159 : vector<32x128xf32>
    %cst_101 = arith.constant dense<0.000000e+00> : vector<128xf32>
    %167 = vector.multi_reduction <add>, %166, %cst_101 [0] : vector<32x128xf32> to vector<128xf32>
    %168 = vector.shape_cast %167 : vector<128xf32> to vector<1x128xf32>
    %cst_102 = arith.constant 3.125000e-02 : f32
    %169 = vector.broadcast %cst_102 : f32 to vector<1x128xf32>
    %170 = arith.mulf %168, %169 : vector<1x128xf32>
    %171 = arith.mulf %165, %165 : vector<1x128xf32>
    %172 = arith.subf %170, %171 : vector<1x128xf32>
    %cst_103 = arith.constant 0.000000e+00 : f32
    %173 = vector.broadcast %cst_103 : f32 to vector<1x128xf32>
    %174 = arith.maximumf %172, %173 : vector<1x128xf32>
    %175 = vector.broadcast %165 : vector<1x128xf32> to vector<32x128xf32>
    %176 = arith.subf %159, %175 : vector<32x128xf32>
    %cst_104 = arith.constant 9.99999974E-6 : f32
    %177 = vector.broadcast %cst_104 : f32 to vector<1x128xf32>
    %178 = arith.addf %174, %177 : vector<1x128xf32>
    %179 = math.rsqrt %178 : vector<1x128xf32>
    %180 = arith.mulf %179, %160 : vector<1x128xf32>
    %181 = vector.broadcast %180 : vector<1x128xf32> to vector<32x128xf32>
    %182 = arith.mulf %176, %181 : vector<32x128xf32>
    %183 = vector.broadcast %161 : vector<1x128xf32> to vector<32x128xf32>
    %184 = arith.addf %182, %183 : vector<32x128xf32>
    %185 = arith.addf %184, %36 : vector<32x128xf32>
    %cst_105 = arith.constant 0.000000e+00 : f32
    %186 = vector.broadcast %cst_105 : f32 to vector<32x128xf32>
    %187 = arith.maximumf %185, %186 : vector<32x128xf32>
    %c0_106 = arith.constant 0 : index
    %c0_107 = arith.constant 0 : index
    %188 = vector.load %arg11[%c0_106, %c0_107] : memref<2x32xf32, #tpu.memory_space<vmem>>, vector<2x32xf32>
    %cst_108 = arith.constant dense<0.000000e+00> : vector<2x128xf32>
    %189 = tpu.matmul %188, %187, %cst_108 {dimension_numbers = #tpu.dot_dimension_numbers<[1], [0], [0], [1], [0, 0, 1, 1], [], []>} : vector<2x32xf32>, vector<32x128xf32>, vector<2x128xf32> -> vector<2x128xf32>
    %c0_109 = arith.constant 0 : index
    %c0_110 = arith.constant 0 : index
    %190 = vector.load %arg12[%c0_109, %c0_110] : memref<128x128xf32, #tpu.memory_space<vmem>>, vector<128x128xf32>
    %cst_111 = arith.constant dense<0.000000e+00> : vector<2x128xf32>
    %191 = tpu.matmul %189, %190, %cst_111 {dimension_numbers = #tpu.dot_dimension_numbers<[1], [0], [0], [1], [0, 0, 1, 1], [], []>} : vector<2x128xf32>, vector<128x128xf32>, vector<2x128xf32> -> vector<2x128xf32>
    %c0_112 = arith.constant 0 : index
    %c0_113 = arith.constant 0 : index
    %192 = vector.load %arg13[%c0_112, %c0_113] : memref<1x128xf32, #tpu.memory_space<vmem>>, vector<1x128xf32>
    %193 = vector.broadcast %192 : vector<1x128xf32> to vector<2x128xf32>
    %194 = arith.addf %191, %193 : vector<2x128xf32>
    %c0_114 = arith.constant 0 : index
    %c0_115 = arith.constant 0 : index
    %195 = vector.load %arg14[%c0_114, %c0_115] : memref<2x128xf32, #tpu.memory_space<vmem>>, vector<2x128xf32>
    tpu.vector_store %arg14[%c0_114, %c0_115], %194 {strides = array<i32>} : memref<2x128xf32, #tpu.memory_space<vmem>>, vector<2x128xf32>,
    return
  }
}

</mosaic_0001>

<bundles_post_ra>
// kernel: resnet_forward.1
= control target key start
LH: loop header
LB: loop body
LE: loop exit
PB: predicated region body
PF: predicated region fallthrough
CT: control target
= control target key end

     0   :  { %vm137_vm0 = vcmask 1043456   ;;  %vm138_vm1 = vcmask 1044480   ;;  %v4270_v2 = vmov 65535   ;;  %vm112_vm2 = vcmask 72704   ;;  %s5262_s0 = inlined_call_operand.vmem [shape: bf16[128,9], index: 0, kind: input, shape index: {}]   ;;  %s5263_s1 = inlined_call_operand.vmem [shape: bf16[9,128], index: 1, kind: input, shape index: {}]   ;;  %s5264_s2 = inlined_call_operand.vmem [shape: f32[1,128], index: 2, kind: input, shape index: {}]   ;;  %s5265_s3 = inlined_call_operand.vmem [shape: f32[1,128], index: 3, kind: input, shape index: {}]   ;;  %s5266_s4 = inlined_call_operand.vmem [shape: bf16[9,32,32], index: 4, kind: input, shape index: {}]   ;;  %s5267_s5 = inlined_call_operand.vmem [shape: bf16[128,1152], index: 5, kind: input, shape index: {}]   ;;  %s5268_s6 = inlined_call_operand.vmem [shape: f32[1,128], index: 6, kind: input, shape index: {}]   ;;  %s5269_s7 = inlined_call_operand.vmem [shape: f32[1,128], index: 7, kind: input, shape index: {}]   ;;  %s5270_s8 = inlined_call_operand.vmem [shape: bf16[128,1152], index: 8, kind: input, shape index: {}]   ;;  %s5271_s9 = inlined_call_operand.vmem [shape: f32[1,128], index: 9, kind: input, shape index: {}]   ;;  %s5272_s10 = inlined_call_operand.vmem [shape: f32[1,128], index: 10, kind: input, shape index: {}]   ;;  %s5273_s11 = inlined_call_operand.vmem [shape: f32[2,32], index: 11, kind: input, shape index: {}]   ;;  %s5274_s12 = inlined_call_operand.vmem [shape: f32[128,128], index: 12, kind: input, shape index: {}]   ;;  %s5275_s13 = inlined_call_operand.vmem [shape: f32[1,128], index: 13, kind: input, shape index: {}]   ;;  %s5276_s14 = inlined_call_operand.hbm [shape: f32[2,128], index: 14, kind: output, shape index: {}]  }
   0x1   :  { %v4005_v0 = vld [vmem:[%s5263_s1] sm:$0x1f]   ;;  %v139_v3 = vsel %vm137_vm0, 4294967295, %v4270_v2  ;;  %v4007_v6 = vld [vmem:[%s5262_s0 + $0x8] sm:$0xff]   ;;  %v4008_v7 = vld [vmem:[%s5262_s0 + $0x10] sm:$0xff]  }
   0x2   :  { %v4006_v1 = vld [vmem:[%s5262_s0] sm:$0xff]   ;;  %v140_v4 = vsel %vm138_vm1, %v139_v3, 0  ;;  %v4009_v8 = vld [vmem:[%s5262_s0 + $0x18] sm:$0xff]   ;;  %v4011_v10 = vld [vmem:[%s5262_s0 + $0x28] sm:$0xff]  }
   0x3   :  { %3659 = vmatprep.mubr.msk.bf16.mxu0 %vm112_vm2, %v4006_v1  ;;  %v142_v5 = vand.u32 %v4005_v0, %v140_v4  ;;  %v4010_v9 = vld [vmem:[%s5262_s0 + $0x20] sm:$0xff]   ;;  %v4012_v11 = vld [vmem:[%s5262_s0 + $0x30] sm:$0xff]   ;;  %v4013_v12 = vld [vmem:[%s5262_s0 + $0x38] sm:$0xff]  }
   0x5   :  { %3657 = vmatprep.subr.bf16.mxu0 %v142_v5 }
   0x6   :  { %3658 = vmatpush3.bf16.msra.mxu0 %v142_v5 }
   0x9   :  { %3660 = vmatmul.mubr.msk.bf16.vlgmr.msra.gmra.mrb[0].mxu0 %vm112_vm2, %v4007_v6 }
   0xa   :  { %3663 = vmatprep.mubr.msk.bf16.mxu0 %vm112_vm2, %v4008_v7 }
  0x11   :  { %3664 = vmatmul.mubr.msk.bf16.gmra.mrb[4].mxu0 %vm112_vm2, %v4009_v8 }
  0x12   :  { %3667 = vmatprep.mubr.msk.bf16.mxu0 %vm112_vm2, %v4010_v9 }
  0x19   :  { %3668 = vmatmul.mubr.msk.bf16.gmra.mrb[8].mxu0 %vm112_vm2, %v4011_v10 }
  0x1a   :  { %3671 = vmatprep.mubr.msk.bf16.mxu0 %vm112_vm2, %v4012_v11 }
  0x21   :  { %3672 = vmatmul.mubr.msk.bf16.gmra.mrb[12].mxu0 %vm112_vm2, %v4013_v12 }
  0x22   :  { %19 = vsyncpa [#allocation3], 0  ;;  %v4014_v13 = vld [vmem:[%s5267_s5 + $0x4] ss:$36 sps:$4 sm:$0xff]   ;;  %v4018_v14 = vld [vmem:[%s5267_s5 + $0xc] ss:$36 sps:$4 sm:$0xff]  }
  0x23   :  { %v4016_v15 = vld [vmem:[%s5267_s5 + $0x8] ss:$36 sps:$4 sm:$0xff]   ;;  %v4019_v16 = vld [vmem:[%s5267_s5] ss:$36 sps:$4 sm:$0xff]   ;;  %845 = vmatprep.subr.bf16.mxu1 %v4014_v13  ;;  %898 = vmatprep.subr.bf16.mxu0 %v4018_v14  ;;  %v4024_v18 = vld [vmem:[%s5267_s5 + $0x54] ss:$36 sps:$4 sm:$0xff]  }
  0x24   :  { %846 = vmatpush1.bf16.msra.mxu1 %v4019_v16  ;;  %899 = vmatpush1.bf16.msra.mxu0 %v4016_v15  ;;  %v4020_v17 = vld [vmem:[%s5267_s5 + $0x4c] ss:$36 sps:$4 sm:$0xff]   ;;  %v4026_v21 = vld [vmem:[%s5267_s5 + $0x94] ss:$36 sps:$4 sm:$0xff]   ;;  %v4030_v22 = vld [vmem:[%s5267_s5 + $0x9c] ss:$36 sps:$4 sm:$0xff]  }
  0x25   :  { %v4022_v19 = vld [vmem:[%s5267_s5 + $0x50] ss:$36 sps:$4 sm:$0xff]   ;;  %v4025_v20 = vld [vmem:[%s5267_s5 + $0x48] ss:$36 sps:$4 sm:$0xff]   ;;  %847 = vmatprep.subr.bf16.mxu1 %v4020_v17  ;;  %900 = vmatprep.subr.bf16.mxu0 %v4024_v18  ;;  %v4028_v23 = vld [vmem:[%s5267_s5 + $0x98] ss:$36 sps:$4 sm:$0xff]  }
  0x26   :  { %v4031_v24 = vld [vmem:[%s5267_s5 + $0x90] ss:$36 sps:$4 sm:$0xff]   ;;  %v4032_v25 = vld [vmem:[%s5267_s5 + $0xdc] ss:$36 sps:$4 sm:$0xff]   ;;  %v4036_v26 = vld [vmem:[%s5267_s5 + $0xe4] ss:$36 sps:$4 sm:$0xff]  }
  0x27   :  { %v4034_v27 = vld [vmem:[%s5267_s5 + $0xe0] ss:$36 sps:$4 sm:$0xff]   ;;  %v4037_v28 = vld [vmem:[%s5267_s5 + $0xd8] ss:$36 sps:$4 sm:$0xff]   ;;  %v4042_v30 = vld [vmem:[%s5267_s5 + $0x12c] ss:$36 sps:$4 sm:$0xff]  }
  0x28   :  { %848 = vmatpush1.bf16.msra.mxu1 %v4025_v20  ;;  %901 = vmatpush1.bf16.msra.mxu0 %v4022_v19  ;;  %v4038_v29 = vld [vmem:[%s5267_s5 + $0x124] ss:$36 sps:$4 sm:$0xff]   ;;  %v4044_v33 = vld [vmem:[%s5267_s5 + $0x16c] ss:$36 sps:$4 sm:$0xff]   ;;  %v4048_v34 = vld [vmem:[%s5267_s5 + $0x174] ss:$36 sps:$4 sm:$0xff]  }
  0x29   :  { %849 = vmatprep.subr.bf16.mxu1 %v4026_v21  ;;  %902 = vmatprep.subr.bf16.mxu0 %v4030_v22  ;;  %v4040_v31 = vld [vmem:[%s5267_s5 + $0x128] ss:$36 sps:$4 sm:$0xff]   ;;  %v4043_v32 = vld [vmem:[%s5267_s5 + $0x120] ss:$36 sps:$4 sm:$0xff]   ;;  %v4046_v35 = vld [vmem:[%s5267_s5 + $0x170] ss:$36 sps:$4 sm:$0xff]  }
  0x2a   :  { %v4049_v36 = vld [vmem:[%s5267_s5 + $0x168] ss:$36 sps:$4 sm:$0xff]   ;;  %v4050_v37 = vld [vmem:[%s5267_s5 + $0x1b4] ss:$36 sps:$4 sm:$0xff]   ;;  %v4054_v38 = vld [vmem:[%s5267_s5 + $0x1bc] ss:$36 sps:$4 sm:$0xff]  }
  0x2b   :  { %v4052_v39 = vld [vmem:[%s5267_s5 + $0x1b8] ss:$36 sps:$4 sm:$0xff]   ;;  %v4055_v40 = vld [vmem:[%s5267_s5 + $0x1b0] ss:$36 sps:$4 sm:$0xff]   ;;  %v4060_v42 = vld [vmem:[%s5267_s5 + $0x204] ss:$36 sps:$4 sm:$0xff]  }
  0x2c   :  { %850 = vmatpush1.bf16.msra.mxu1 %v4031_v24  ;;  %903 = vmatpush1.bf16.msra.mxu0 %v4028_v23  ;;  %v4056_v41 = vld [vmem:[%s5267_s5 + $0x1fc] ss:$36 sps:$4 sm:$0xff]   ;;  %v4064_v45 = vld [vmem:[%s5267_s5 + $0x14] ss:$36 sps:$4 sm:$0xff]   ;;  %v4271_v47 = vmov 0   ;;  %vm1143_vm3 = vcmask 261120  }
  0x2d   :  { %851 = vmatprep.subr.bf16.mxu1 %v4032_v25  ;;  %904 = vmatprep.subr.bf16.mxu0 %v4036_v26  ;;  %v4058_v43 = vld [vmem:[%s5267_s5 + $0x200] ss:$36 sps:$4 sm:$0xff]   ;;  %v4061_v44 = vld [vmem:[%s5267_s5 + $0x1f8] ss:$36 sps:$4 sm:$0xff]   ;;  %vm4273_vm4 = vmmov 0   ;;  %s4275_s17 = smov [#allocation2]  }
  0x2e   :  { %v4067_v46 = vld [vmem:[%s5267_s5 + $0x1c] ss:$36 sps:$4 sm:$0xff]   ;;  %877 = vmatprep.mubr.bf16.mxu1 %v4271_v47  ;;  %930 = vmatprep.mubr.bf16.mxu0 %v4271_v47  ;;  %s3274_s18 = sshll.u32 %s4275_s17, 4  ;;  %s3275_s18 = int_to_ptr.vmem [resolvable:$true] %s3274_s18 }
  0x2f   :  { %p4251_p1 = scmp.lt.s32.totalorder %s3275_s18, %s3275_s18 }
  0x30   :  { %852 = vmatpush1.bf16.msra.mxu1 %v4037_v28  ;;  %905 = vmatpush1.bf16.msra.mxu0 %v4034_v27 }
  0x31   :  { %853 = vmatprep.subr.bf16.mxu1 %v4038_v29  ;;  %906 = vmatprep.subr.bf16.mxu0 %v4042_v30 }
  0x34   :  { %854 = vmatpush1.bf16.msra.mxu1 %v4043_v32  ;;  %907 = vmatpush1.bf16.msra.mxu0 %v4040_v31 }
  0x35   :  { %855 = vmatprep.subr.bf16.mxu1 %v4044_v33  ;;  %908 = vmatprep.subr.bf16.mxu0 %v4048_v34 }
  0x38   :  { %856 = vmatpush1.bf16.msra.mxu1 %v4049_v36  ;;  %909 = vmatpush1.bf16.msra.mxu0 %v4046_v35 }
  0x39   :  { %857 = vmatprep.subr.bf16.mxu1 %v4050_v37  ;;  %910 = vmatprep.subr.bf16.mxu0 %v4054_v38 }
  0x3c   :  { %858 = vmatpush1.bf16.msra.mxu1 %v4055_v40  ;;  %911 = vmatpush1.bf16.msra.mxu0 %v4052_v39 }
  0x3d   :  { %859 = vmatprep.subr.bf16.mxu1 %v4056_v41  ;;  %912 = vmatprep.subr.bf16.mxu0 %v4060_v42 }
  0x40   :  { %860 = vmatpush1.bf16.msra.mxu1 %v4061_v44  ;;  %913 = vmatpush1.bf16.msra.mxu0 %v4058_v43 }
  0x41   :  { %951 = vmatprep.subr.bf16.mxu1 %v4064_v45  ;;  %1004 = vmatprep.subr.bf16.mxu0 %v4067_v46 }
  0xdc   :  { %v4490_v48 = vpop.f32.mrb[0].mxu0 }
  0xdd   :  { %v4492_v49 = vpop.f32.mrb[1].mxu0  ;;  %v267_v55 = vmul.f32 %v4490_v48, %v4490_v48 }
  0xde   :  { %v4494_v50 = vpop.f32.mrb[2].mxu0  ;;  %v265_v52 = vmul.f32 %v4492_v49, %v4492_v49 }
  0xdf   :  { %v4496_v51 = vpop.f32.mrb[3].mxu0  ;;  %v268_v58 = vmul.f32 %v4494_v50, %v4494_v50 }
  0xe0   :  { %v243_v53 = vadd.f32 %v4496_v51, %v4492_v49  ;;  %v266_v54 = vmul.f32 %v4496_v51, %v4496_v51 }
  0xe2   :  { %v244_v56 = vadd.f32 %v4490_v48, %v243_v53  ;;  %v281_v57 = vadd.f32 %v266_v54, %v265_v52 }
  0xe4   :  { %v282_v59 = vadd.f32 %v281_v57, %v267_v55  ;;  %v4509_v60 = vpop.f32.mrb[4].mxu0  ;;  %v245_v61 = vadd.f32 %v4494_v50, %v244_v56 }
  0xe5   :  { %v4512_v62 = vpop.f32.mrb[5].mxu0  ;;  %v271_v7 = vmul.f32 %v4509_v60, %v4509_v60 }
  0xe6   :  { %v246_v63 = vadd.f32 %v245_v61, %v4512_v62  ;;  %v269_v0 = vmul.f32 %v4512_v62, %v4512_v62  ;;  %v283_v1 = vadd.f32 %v282_v59, %v268_v58  ;;  %v4517_v2 = vpop.f32.mrb[6].mxu0 }
  0xe7   :  { %v4519_v3 = vpop.f32.mrb[7].mxu0  ;;  %v272_v10 = vmul.f32 %v4517_v2, %v4517_v2 }
  0xe8   :  { %v284_v4 = vadd.f32 %v283_v1, %v269_v0  ;;  %v247_v5 = vadd.f32 %v246_v63, %v4519_v3  ;;  %v270_v6 = vmul.f32 %v4519_v3, %v4519_v3 }
  0xea   :  { %v248_v8 = vadd.f32 %v4509_v60, %v247_v5  ;;  %v285_v9 = vadd.f32 %v284_v4, %v270_v6 }
  0xec   :  { %v286_v11 = vadd.f32 %v285_v9, %v271_v7  ;;  %v4529_v12 = vpop.f32.mrb[8].mxu0  ;;  %v249_v13 = vadd.f32 %v4517_v2, %v248_v8 }
  0xed   :  { %v4532_v14 = vpop.f32.mrb[9].mxu0  ;;  %v275_v23 = vmul.f32 %v4529_v12, %v4529_v12 }
  0xee   :  { %v250_v15 = vadd.f32 %v249_v13, %v4532_v14  ;;  %v273_v16 = vmul.f32 %v4532_v14, %v4532_v14  ;;  %v287_v17 = vadd.f32 %v286_v11, %v272_v10  ;;  %v4537_v18 = vpop.f32.mrb[10].mxu0 }
  0xef   :  { %v4539_v19 = vpop.f32.mrb[11].mxu0  ;;  %v276_v26 = vmul.f32 %v4537_v18, %v4537_v18 }
  0xf0   :  { %v288_v20 = vadd.f32 %v287_v17, %v273_v16  ;;  %v251_v21 = vadd.f32 %v250_v15, %v4539_v19  ;;  %v274_v22 = vmul.f32 %v4539_v19, %v4539_v19 }
  0xf2   :  { %v252_v24 = vadd.f32 %v4529_v12, %v251_v21  ;;  %v289_v25 = vadd.f32 %v288_v20, %v274_v22  ;;  %v325_v21 = vlaneseq }
  0xf4   :  { %v290_v27 = vadd.f32 %v289_v25, %v275_v23  ;;  %v4549_v28 = vpop.f32.mrb[12].mxu0  ;;  %v253_v29 = vadd.f32 %v4537_v18, %v252_v24  ;;  %v3299_v24 = vld [vmem:[%s5265_s3] ss:$0 sm:$0xff] }
  0xf5   :  { %v4552_v30 = vpop.f32.mrb[13].mxu0  ;;  %v279_v39 = vmul.f32 %v4549_v28, %v4549_v28 }
  0xf6   :  { %v254_v31 = vadd.f32 %v253_v29, %v4552_v30  ;;  %v277_v32 = vmul.f32 %v4552_v30, %v4552_v30  ;;  %v291_v33 = vadd.f32 %v290_v27, %v276_v26  ;;  %v4557_v34 = vpop.f32.mrb[14].mxu0 }
  0xf7   :  { %v229_v35 = vpop.f32.mrb[15].mxu0  ;;  %v280_v42 = vmul.f32 %v4557_v34, %v4557_v34 }
  0xf8   :  { %v292_v36 = vadd.f32 %v291_v33, %v277_v32  ;;  %v255_v37 = vadd.f32 %v254_v31, %v229_v35  ;;  %v278_v38 = vmul.f32 %v229_v35, %v229_v35 }
  0xfa   :  { %v256_v40 = vadd.f32 %v4549_v28, %v255_v37  ;;  %v293_v41 = vadd.f32 %v292_v36, %v278_v38 }
  0xfc   :  { %v257_v43 = vadd.f32 %v4557_v34, %v256_v40  ;;  %v294_v44 = vadd.f32 %v293_v41, %v279_v39 }
  0xfe   :  { %v258_v45 = vrot.slane %v257_v43, 4  ;;  %v295_v46 = vadd.f32 %v294_v44, %v280_v42 }
 0x100   :  { %v259_v52 = vadd.f32 %v258_v45, %v257_v43  ;;  %v296_v53 = vrot.slane %v295_v46, 4 }
 0x102   :  { %v260_v54 = vrot.slane %v259_v52, 2  ;;  %v297_v55 = vadd.f32 %v296_v53, %v295_v46 }
 0x104   :  { %v261_v56 = vadd.f32 %v260_v54, %v259_v52  ;;  %v298_v57 = vrot.slane %v297_v55, 2 }
 0x106   :  { %v262_v58 = vrot.slane %v261_v56, 1  ;;  %v299_v59 = vadd.f32 %v298_v57, %v297_v55 }
 0x108   :  { %v263_v61 = vadd.f32 %v262_v58, %v261_v56  ;;  %v300_v63 = vrot.slane %v299_v59, 1 }
 0x10a   :  { %v4565_v0 = vmul.f32 0.0078125, %v263_v61  ;;  %v301_v1 = vadd.f32 %v300_v63, %v299_v59 }
 0x10c   :  { %v302_v4 = vmul.f32 0.0078125, %v301_v1  ;;  %v303_v5 = vmul.f32 %v4565_v0, %v4565_v0  ;;  %v307_v6 = vsub.f32 %v4496_v51, %v4565_v0  ;;  %v311_v7 = vsub.f32 %v4519_v3, %v4565_v0 }
 0x10d   :  { %v315_v8 = vsub.f32 %v4539_v19, %v4565_v0  ;;  %v319_v9 = vsub.f32 %v229_v35, %v4565_v0  ;;  %v306_v10 = vsub.f32 %v4492_v49, %v4565_v0  ;;  %v310_v11 = vsub.f32 %v4512_v62, %v4565_v0 }
 0x10e   :  { %v304_v13 = vsub.f32 %v302_v4, %v303_v5  ;;  %v314_v15 = vsub.f32 %v4532_v14, %v4565_v0  ;;  %v318_v51 = vsub.f32 %v4552_v30, %v4565_v0  ;;  %v308_v3 = vsub.f32 %v4490_v48, %v4565_v0 }
 0x10f   :  { %v309_v16 = vsub.f32 %v4494_v50, %v4565_v0  ;;  %v312_v17 = vsub.f32 %v4509_v60, %v4565_v0  ;;  %v313_v49 = vsub.f32 %v4517_v2, %v4565_v0  ;;  %v316_v62 = vsub.f32 %v4529_v12, %v4565_v0  ;;  %v241_v2 = vld [vmem:[%s5264_s2] sm:$0x1] }
 0x110   :  { %v305_v19 = vmax.f32 %v304_v13, 0.0  ;;  %v317_v14 = vsub.f32 %v4537_v18, %v4565_v0  ;;  %v320_v20 = vsub.f32 %v4549_v28, %v4565_v0  ;;  %v321_v48 = vsub.f32 %v4557_v34, %v4565_v0 }
 0x111   :  { %v326_v60 = vshrl.u32 %v325_v21, 7 }
 0x112   :  { %v322_v50 = vadd.f32 1e-05, %v305_v19 }
 0x113   :  { %v4603_v22 = vsub.s32 0, %v326_v60 }
 0x114   :  { %4240 = vrsqrt.f32 %v322_v50 }
 0x11e   :  { %v4241_v12 = vpop.eup %4240 }
 0x11f   :  { %v324_v23 = vmul.f32 %v4241_v12, %v241_v2 }
 0x121   :  { %v328_v18 = vrot.slane %v324_v23, %v4603_v22  ;;  %v4068_v23 = vld [vmem:[%s5267_s5 + $0x58] ss:$36 sps:$4 sm:$0xff]  }
 0x123   :  { %v330_v25 = vmul.f32 %v328_v18, %v307_v6  ;;  %v334_v26 = vmul.f32 %v328_v18, %v311_v7  ;;  %v338_v27 = vmul.f32 %v328_v18, %v315_v8  ;;  %v342_v28 = vmul.f32 %v328_v18, %v319_v9 }
 0x124   :  { %v329_v29 = vmul.f32 %v328_v18, %v306_v10  ;;  %v333_v30 = vmul.f32 %v328_v18, %v310_v11  ;;  %v337_v31 = vmul.f32 %v328_v18, %v314_v15  ;;  %v341_v32 = vmul.f32 %v328_v18, %v318_v51  ;;  %v4062_v10 = vld [vmem:[%s5267_s5 + $0x10] ss:$36 sps:$4 sm:$0xff]   ;;  %v4065_v11 = vld [vmem:[%s5267_s5 + $0x18] ss:$36 sps:$4 sm:$0xff]  }
 0x125   :  { %v352_v33 = vadd.f32 %v3299_v24, %v330_v25  ;;  %v356_v34 = vadd.f32 %v3299_v24, %v334_v26  ;;  %v360_v35 = vadd.f32 %v3299_v24, %v338_v27  ;;  %v364_v36 = vadd.f32 %v3299_v24, %v342_v28  ;;  %v4076_v26 = vld [vmem:[%s5267_s5 + $0xa4] ss:$36 sps:$4 sm:$0xff]   ;;  %v4079_v27 = vld [vmem:[%s5267_s5 + $0xac] ss:$36 sps:$4 sm:$0xff]  }
 0x126   :  { %v351_v37 = vadd.f32 %v3299_v24, %v329_v29  ;;  %v355_v38 = vadd.f32 %v3299_v24, %v333_v30  ;;  %v359_v39 = vadd.f32 %v3299_v24, %v337_v31  ;;  %v363_v40 = vadd.f32 %v3299_v24, %v341_v32  ;;  %v4074_v32 = vld [vmem:[%s5267_s5 + $0xa0] ss:$36 sps:$4 sm:$0xff]  }
 0x127   :  { %v368_v41 = vmax.f32 %v352_v33, 0.0  ;;  %v372_v42 = vmax.f32 %v356_v34, 0.0  ;;  %v376_v43 = vmax.f32 %v360_v35, 0.0  ;;  %v380_v44 = vmax.f32 %v364_v36, 0.0  ;;  %v4077_v33 = vld [vmem:[%s5267_s5 + $0xa8] ss:$36 sps:$4 sm:$0xff]  }
 0x128   :  { %v367_v45 = vmax.f32 %v351_v37, 0.0  ;;  %v371_v46 = vmax.f32 %v355_v38, 0.0  ;;  %v375_v52 = vmax.f32 %v359_v39, 0.0  ;;  %v379_v53 = vmax.f32 %v363_v40, 0.0  ;;  %v4082_v35 = vld [vmem:[%s5267_s5 + $0xec] ss:$36 sps:$4 sm:$0xff]  }
 0x129   :  { %v384_v54 = vmax.f32 %v368_v41, %v372_v42  ;;  %v388_v55 = vmax.f32 %v376_v43, %v380_v44  ;;  %v331_v56 = vmul.f32 %v328_v18, %v308_v3  ;;  %v332_v57 = vmul.f32 %v328_v18, %v309_v16  ;;  %v4085_v36 = vld [vmem:[%s5267_s5 + $0xf4] ss:$36 sps:$4 sm:$0xff]   ;;  %v4080_v37 = vld [vmem:[%s5267_s5 + $0xe8] ss:$36 sps:$4 sm:$0xff]   ;;  %v4091_v40 = vld [vmem:[%s5267_s5 + $0x13c] ss:$36 sps:$4 sm:$0xff]  }
 0x12a   :  { %v383_v58 = vmax.f32 %v367_v45, %v371_v46  ;;  %v387_v59 = vmax.f32 %v375_v52, %v379_v53  ;;  %v335_v61 = vmul.f32 %v328_v18, %v312_v17  ;;  %v336_v63 = vmul.f32 %v328_v18, %v313_v49  ;;  %v4070_v17 = vld [vmem:[%s5267_s5 + $0x5c] ss:$36 sps:$4 sm:$0xff]   ;;  %v4073_v49 = vld [vmem:[%s5267_s5 + $0x64] ss:$36 sps:$4 sm:$0xff]   ;;  %v4083_v38 = vld [vmem:[%s5267_s5 + $0xf0] ss:$36 sps:$4 sm:$0xff]  }
 0x12b   :  { %v4609_v0 = vmax.f32 %v384_v54, %v388_v55  ;;  %v339_v1 = vmul.f32 %v328_v18, %v316_v62  ;;  %v340_v4 = vmul.f32 %v328_v18, %v317_v14  ;;  %v343_v5 = vmul.f32 %v328_v18, %v320_v20  ;;  %v4088_v39 = vld [vmem:[%s5267_s5 + $0x134] ss:$36 sps:$4 sm:$0xff]   ;;  %v4094_v43 = vld [vmem:[%s5267_s5 + $0x17c] ss:$36 sps:$4 sm:$0xff]   ;;  %v4097_v44 = vld [vmem:[%s5267_s5 + $0x184] ss:$36 sps:$4 sm:$0xff]  }
 0x12c   :  { %v4611_v6 = vmax.f32 %v383_v58, %v387_v59  ;;  %v344_v7 = vmul.f32 %v328_v18, %v321_v48  ;;  %v353_v8 = vadd.f32 %v3299_v24, %v331_v56  ;;  %v354_v9 = vadd.f32 %v3299_v24, %v332_v57  ;;  %v4071_v18 = vld [vmem:[%s5267_s5 + $0x60] ss:$36 sps:$4 sm:$0xff]   ;;  %v4086_v41 = vld [vmem:[%s5267_s5 + $0x130] ss:$36 sps:$4 sm:$0xff]   ;;  %v4089_v42 = vld [vmem:[%s5267_s5 + $0x138] ss:$36 sps:$4 sm:$0xff]  }
 0x12d   :  { %v357_v13 = vadd.f32 %v3299_v24, %v335_v61  ;;  %v358_v15 = vadd.f32 %v3299_v24, %v336_v63  ;;  %v361_v51 = vadd.f32 %v3299_v24, %v339_v1  ;;  %v362_v3 = vadd.f32 %v3299_v24, %v340_v4  ;;  %v4092_v45 = vld [vmem:[%s5267_s5 + $0x178] ss:$36 sps:$4 sm:$0xff]   ;;  %v4095_v46 = vld [vmem:[%s5267_s5 + $0x180] ss:$36 sps:$4 sm:$0xff]   ;;  %v4103_v53 = vld [vmem:[%s5267_s5 + $0x1cc] ss:$36 sps:$4 sm:$0xff]  }
 0x12e   :  { %v4621_v16 = vpack.c.bf16 %v4609_v0, %v4611_v6  ;;  %v365_v62 = vadd.f32 %v3299_v24, %v343_v5  ;;  %v366_v19 = vadd.f32 %v3299_v24, %v344_v7  ;;  %v369_v14 = vmax.f32 %v353_v8, 0.0  ;;  %v4100_v52 = vld [vmem:[%s5267_s5 + $0x1c4] ss:$36 sps:$4 sm:$0xff]   ;;  %v4106_v56 = vld [vmem:[%s5267_s5 + $0x20c] ss:$36 sps:$4 sm:$0xff]  }
 0x12f   :  { %v370_v20 = vmax.f32 %v354_v9, 0.0  ;;  %v373_v48 = vmax.f32 %v357_v13, 0.0  ;;  %v374_v50 = vmax.f32 %v358_v15, 0.0  ;;  %v377_v21 = vmax.f32 %v361_v51, 0.0  ;;  %v4098_v54 = vld [vmem:[%s5267_s5 + $0x1c0] ss:$36 sps:$4 sm:$0xff]  }
 0x130   :  { %878 = vmatmul.mubr.bf16.vlgmr.msra.gmra.mrb[0].mxu1 %v4621_v16  ;;  %931 = vmatmul.mubr.bf16.vlgmr.msra.gmra.mrb[16].mxu0 %v4621_v16  ;;  %v378_v60 = vmax.f32 %v362_v3, 0.0  ;;  %v381_v2 = vmax.f32 %v365_v62, 0.0  ;;  %v382_v12 = vmax.f32 %v366_v19, 0.0  ;;  %v4101_v55 = vld [vmem:[%s5267_s5 + $0x1c8] ss:$36 sps:$4 sm:$0xff]  }
 0x131   :  { %952 = vmatpush1.bf16.msra.mxu1 %v4062_v10  ;;  %1005 = vmatpush1.bf16.msra.mxu0 %v4065_v11  ;;  %v385_v24 = vmax.f32 %v369_v14, %v373_v48  ;;  %v386_v25 = vmax.f32 %v370_v20, %v374_v50  ;;  %v4109_v57 = vld [vmem:[%s5267_s5 + $0x214] ss:$36 sps:$4 sm:$0xff]   ;;  %v4104_v58 = vld [vmem:[%s5267_s5 + $0x208] ss:$36 sps:$4 sm:$0xff]   ;;  %v4110_v61 = vld [vmem:[%s5267_s5 + $0x20] ss:$36 sps:$4 sm:$0xff]  }
 0x132   :  { %953 = vmatprep.subr.bf16.mxu1 %v4070_v17  ;;  %1006 = vmatprep.subr.bf16.mxu0 %v4073_v49  ;;  %v389_v28 = vmax.f32 %v377_v21, %v381_v2  ;;  %v390_v29 = vmax.f32 %v378_v60, %v382_v12  ;;  %v4107_v59 = vld [vmem:[%s5267_s5 + $0x210] ss:$36 sps:$4 sm:$0xff]   ;;  %v4111_v63 = vld [vmem:[%s5267_s5 + $0x68] ss:$36 sps:$4 sm:$0xff]   ;;  %v4113_v4 = vld [vmem:[%s5267_s5 + $0xf8] ss:$36 sps:$4 sm:$0xff]  }
 0x133   :  { %887 = vmatprep.mubr.bf16.mxu1 %v4271_v47  ;;  %940 = vmatprep.mubr.bf16.mxu0 %v4271_v47  ;;  %v4112_v1 = vld [vmem:[%s5267_s5 + $0xb0] ss:$36 sps:$4 sm:$0xff]   ;;  %v4114_v5 = vld [vmem:[%s5267_s5 + $0x140] ss:$36 sps:$4 sm:$0xff]   ;;  %v4115_v7 = vld [vmem:[%s5267_s5 + $0x188] ss:$36 sps:$4 sm:$0xff]  }
 0x134   :  { %v4645_v30 = vmax.f32 %v385_v24, %v389_v28  ;;  %v4647_v31 = vmax.f32 %v386_v25, %v390_v29  ;;  %v4116_v8 = vld [vmem:[%s5267_s5 + $0x1d0] ss:$36 sps:$4 sm:$0xff]   ;;  %v4117_v9 = vld [vmem:[%s5267_s5 + $0x218] ss:$36 sps:$4 sm:$0xff]   ;;  %v4771_v29 = vld [vmem:[%s5266_s4] sm:$0xff]  }
 0x135   :  { %954 = vmatpush1.bf16.msra.mxu1 %v4068_v23  ;;  %1007 = vmatpush1.bf16.msra.mxu0 %v4071_v18  ;;  %v4759_v10 = vld [vmem:[%s5266_s4 + $0x10] sm:$0xff]   ;;  %v4766_v28 = vld [vmem:[%s5266_s4 + $0x18] sm:$0xff]  }
 0x136   :  { %955 = vmatprep.subr.bf16.mxu1 %v4076_v26  ;;  %1008 = vmatprep.subr.bf16.mxu0 %v4079_v27  ;;  %v4657_v34 = vpack.c.bf16 %v4647_v31, %v4645_v30 }
 0x138   :  { %888 = vmatmul.mubr.bf16.gmra.mrb[4].mxu1 %v4657_v34  ;;  %941 = vmatmul.mubr.bf16.gmra.mrb[20].mxu0 %v4657_v34 }
 0x139   :  { %956 = vmatpush1.bf16.msra.mxu1 %v4074_v32  ;;  %1009 = vmatpush1.bf16.msra.mxu0 %v4077_v33  ;;  %v4780_v32 = vld [vmem:[%s5266_s4 + $0x8] sm:$0xff]   ;;  %v4785_v33 = vld [vmem:[%s5266_s4 + $0x20] sm:$0xff]  }
 0x13a   :  { %957 = vmatprep.subr.bf16.mxu1 %v4082_v35  ;;  %1010 = vmatprep.subr.bf16.mxu0 %v4085_v36 }
 0x13b   :  { %983 = vmatprep.mubr.bf16.mxu1 %v4271_v47  ;;  %1036 = vmatprep.mubr.bf16.mxu0 %v4271_v47 }
 0x13d   :  { %958 = vmatpush1.bf16.msra.mxu1 %v4080_v37  ;;  %1011 = vmatpush1.bf16.msra.mxu0 %v4083_v38 }
 0x13e   :  { %959 = vmatprep.subr.bf16.mxu1 %v4088_v39  ;;  %1012 = vmatprep.subr.bf16.mxu0 %v4091_v40 }
 0x141   :  { %960 = vmatpush1.bf16.msra.mxu1 %v4086_v41  ;;  %1013 = vmatpush1.bf16.msra.mxu0 %v4089_v42 }
 0x142   :  { %961 = vmatprep.subr.bf16.mxu1 %v4094_v43  ;;  %1014 = vmatprep.subr.bf16.mxu0 %v4097_v44 }
 0x145   :  { %962 = vmatpush1.bf16.msra.mxu1 %v4092_v45  ;;  %1015 = vmatpush1.bf16.msra.mxu0 %v4095_v46  ;;  %v4794_v46 = vld [vmem:[%s5266_s4 + $0x28] sm:$0xff]  }
 0x146   :  { %963 = vmatprep.subr.bf16.mxu1 %v4100_v52  ;;  %1016 = vmatprep.subr.bf16.mxu0 %v4103_v53  ;;  %v4799_v52 = vld [vmem:[%s5266_s4 + $0x30] sm:$0xff]  }
 0x149   :  { %964 = vmatpush1.bf16.msra.mxu1 %v4098_v54  ;;  %1017 = vmatpush1.bf16.msra.mxu0 %v4101_v55 }
 0x14a   :  { %965 = vmatprep.subr.bf16.mxu1 %v4106_v56  ;;  %1018 = vmatprep.subr.bf16.mxu0 %v4109_v57 }
 0x14d   :  { %966 = vmatpush1.bf16.msra.mxu1 %v4104_v58  ;;  %1019 = vmatpush1.bf16.msra.mxu0 %v4107_v59 }
 0x14e   :  { %3675 = vmatprep.subr.bf16.mxu1 %v4110_v61 }
 0x150   :  { %984 = vmatmul.mubr.bf16.vlgmr.msra.gmra.mrb[8].mxu1 %v4621_v16  ;;  %1037 = vmatmul.mubr.bf16.vlgmr.msra.gmra.mrb[24].mxu0 %v4621_v16 }
 0x151   :  { %3676 = vmatpush3.bf16.msra.mxu1 %v4110_v61  ;;  %993 = vmatprep.mubr.bf16.mxu1 %v4271_v47 }
 0x152   :  { %3677 = vmatprep.subr.bf16.mxu1 %v4111_v63  ;;  %1046 = vmatprep.mubr.bf16.mxu0 %v4271_v47 }
 0x155   :  { %3678 = vmatpush3.bf16.msra.mxu1 %v4111_v63 }
 0x156   :  { %3679 = vmatprep.subr.bf16.mxu1 %v4112_v1 }
 0x158   :  { %994 = vmatmul.mubr.bf16.gmra.mrb[12].mxu1 %v4657_v34  ;;  %1047 = vmatmul.mubr.bf16.gmra.mrb[28].mxu0 %v4657_v34 }
 0x159   :  { %3680 = vmatpush3.bf16.msra.mxu1 %v4112_v1  ;;  %3691 = vmatprep.mubr.bf16.mxu1 %v4621_v16 }
 0x15a   :  { %3681 = vmatprep.subr.bf16.mxu1 %v4113_v4  ;;  %3699 = vmatprep.mubr.msk.bf16.mxu0 %vm1143_vm3, %v4759_v10 }
 0x15d   :  { %3682 = vmatpush3.bf16.msra.mxu1 %v4113_v4 }
 0x15e   :  { %3683 = vmatprep.subr.bf16.mxu1 %v4114_v5 }
 0x161   :  { %3684 = vmatpush3.bf16.msra.mxu1 %v4114_v5 }
 0x162   :  { %3685 = vmatprep.subr.bf16.mxu1 %v4115_v7 }
 0x165   :  { %3686 = vmatpush3.bf16.msra.mxu1 %v4115_v7  ;;  %v4808_v7 = vld [vmem:[%s5266_s4 + $0x38] sm:$0xff]  }
 0x166   :  { %3687 = vmatprep.subr.bf16.mxu1 %v4116_v8 }
 0x169   :  { %3688 = vmatpush3.bf16.msra.mxu1 %v4116_v8  ;;  %v4813_v8 = vld [vmem:[%s5266_s4 + $0x40] sm:$0xff]  }
 0x16a   :  { %3689 = vmatprep.subr.bf16.mxu1 %v4117_v9 }
 0x16d   :  { %3690 = vmatpush3.bf16.msra.mxu1 %v4117_v9  ;;  %v4822_v9 = vld [vmem:[%s5266_s4 + $0x48] sm:$0xff]  }
 0x170   :  { %3692 = vmatmul.mubr.bf16.vlgmr.msra.gmra.mrb[16].mxu1 %v4657_v34 }
 0x171   :  { %2322 = vmatprep.mubr.bf16.mxu1 %v4271_v47 }
 0x203   :  { %v879_v11 = vpop.f32.mrb[0].mxu1  ;;  %v932_v13 = vpop.f32.mrb[16].mxu0 }
 0x204   :  { %v881_v15 = vpop.f32.mrb[1].mxu1  ;;  %v934_v51 = vpop.f32.mrb[17].mxu0 }
 0x205   :  { %v883_v3 = vpop.f32.mrb[2].mxu1  ;;  %v936_v16 = vpop.f32.mrb[18].mxu0 }
 0x206   :  { %v1106_v17 = vpack.c.bf16 %v883_v3, %v879_v11  ;;  %v1108_v49 = vpack.c.bf16 %v936_v16, %v932_v13  ;;  %v885_v62 = vpop.f32.mrb[3].mxu1  ;;  %v938_v19 = vpop.f32.mrb[19].mxu0  ;;  %v4827_v11 = vld [vmem:[%s5266_s4 + $0x50] sm:$0xff]  }
 0x207   :  { %v1107_v14 = vpack.c.bf16 %v885_v62, %v881_v15  ;;  %v1109_v20 = vpack.c.bf16 %v938_v19, %v934_v51  ;;  %v4841_v62 = vld [vmem:[%s5266_s4 + $0x60] sm:$0xff]   ;;  %v4850_v19 = vld [vmem:[%s5266_s4 + $0x68] sm:$0xff]  }
 0x209   :  { %3695 = vmatprep.subr.bf16.mxu0 %v1107_v14 }
 0x20a   :  { %3696 = vmatpush3.bf16.msra.mxu0 %v1107_v14  ;;  %v4855_v14 = vld [vmem:[%s5266_s4 + $0x70] sm:$0xff]  }
 0x20b   :  { %v889_v48 = vpop.f32.mrb[4].mxu1  ;;  %v942_v50 = vpop.f32.mrb[20].mxu0 }
 0x20c   :  { %v891_v21 = vpop.f32.mrb[5].mxu1  ;;  %v944_v60 = vpop.f32.mrb[21].mxu0 }
 0x20d   :  { %v893_v2 = vpop.f32.mrb[6].mxu1  ;;  %v946_v12 = vpop.f32.mrb[22].mxu0 }
 0x20e   :  { %v1115_v23 = vpack.c.bf16 %v893_v2, %v889_v48  ;;  %v1117_v18 = vpack.c.bf16 %v946_v12, %v942_v50  ;;  %v895_v24 = vpop.f32.mrb[7].mxu1  ;;  %v948_v25 = vpop.f32.mrb[23].mxu0  ;;  %v4869_v48 = vld [vmem:[%s5266_s4 + $0x80] sm:$0xff]   ;;  %v4878_v50 = vld [vmem:[%s5266_s4 + $0x88] sm:$0xff]   ;;  %v4139_v12 = vld [vmem:[%s5270_s8 + $0x10] ss:$36 sps:$4 sm:$0xff]  }
 0x20f   :  { %v1116_v26 = vpack.c.bf16 %v895_v24, %v891_v21  ;;  %v1118_v27 = vpack.c.bf16 %v948_v25, %v944_v60  ;;  %v4138_v21 = vld [vmem:[%s5270_s8 + $0x4] ss:$36 sps:$4 sm:$0xff]   ;;  %v4141_v60 = vld [vmem:[%s5270_s8 + $0x14] ss:$36 sps:$4 sm:$0xff]  }
 0x210   :  { %v4136_v2 = vld [vmem:[%s5270_s8] ss:$36 sps:$4 sm:$0xff]   ;;  %2290 = vmatprep.subr.bf16.mxu1 %v4138_v21  ;;  %v4142_v24 = vld [vmem:[%s5270_s8 + $0x48] ss:$36 sps:$4 sm:$0xff]   ;;  %v4145_v25 = vld [vmem:[%s5270_s8 + $0x58] ss:$36 sps:$4 sm:$0xff]  }
 0x211   :  { %3697 = vmatprep.subr.bf16.mxu0 %v1116_v26  ;;  %2291 = vmatpush1.bf16.msra.mxu1 %v4136_v2 }
 0x212   :  { %3698 = vmatpush3.bf16.msra.mxu0 %v1116_v26  ;;  %v4150_v26 = vld [vmem:[%s5270_s8 + $0x94] ss:$36 sps:$4 sm:$0xff]  }
 0x213   :  { %3703 = vmatprep.subr.bf16.mxu0 %v1106_v17 }
 0x215   :  { %3700 = vmatmul.mubr.msk.bf16.vlgmr.msra.gmra.mrb[32].mxu0 %vm1143_vm3, %v4766_v28 }
 0x216   :  { %3704 = vmatpush3.bf16.msra.mxu0 %v1106_v17  ;;  %3707 = vmatprep.mubr.msk.bf16.mxu0 %vm1143_vm3, %v4771_v29 }
 0x217   :  { %3705 = vmatprep.subr.bf16.mxu0 %v1115_v23 }
 0x21a   :  { %3706 = vmatpush3.bf16.msra.mxu0 %v1115_v23  ;;  %v4144_v23 = vld [vmem:[%s5270_s8 + $0x4c] ss:$36 sps:$4 sm:$0xff]  }
 0x21b   :  { %3711 = vmatprep.subr.bf16.mxu0 %v1108_v49  ;;  %2292 = vmatprep.subr.bf16.mxu1 %v4144_v23 }
 0x21c   :  { %2293 = vmatpush1.bf16.msra.mxu1 %v4142_v24 }
 0x21d   :  { %2294 = vmatprep.subr.bf16.mxu1 %v4150_v26 }
 0x221   :  { %3708 = vmatmul.mubr.msk.bf16.vlgmr.msra.gmra.mrb[32].mxu0 %vm1143_vm3, %v4780_v32 }
 0x222   :  { %3712 = vmatpush3.bf16.msra.mxu0 %v1108_v49  ;;  %3715 = vmatprep.mubr.msk.bf16.mxu0 %vm1143_vm3, %v4785_v33  ;;  %v4836_v49 = vld [vmem:[%s5266_s4 + $0x58] sm:$0xff]  }
 0x223   :  { %v985_v34 = vpop.f32.mrb[8].mxu1  ;;  %v1038_v35 = vpop.f32.mrb[24].mxu0  ;;  %3713 = vmatprep.subr.bf16.mxu0 %v1117_v18 }
 0x224   :  { %v987_v36 = vpop.f32.mrb[9].mxu1  ;;  %v1040_v37 = vpop.f32.mrb[25].mxu0 }
 0x225   :  { %v989_v38 = vpop.f32.mrb[10].mxu1  ;;  %v1042_v39 = vpop.f32.mrb[26].mxu0 }
 0x226   :  { %v1110_v40 = vpack.c.bf16 %v989_v38, %v985_v34  ;;  %v1112_v41 = vpack.c.bf16 %v1042_v39, %v1038_v35  ;;  %v991_v42 = vpop.f32.mrb[11].mxu1  ;;  %v1044_v43 = vpop.f32.mrb[27].mxu0  ;;  %3714 = vmatpush3.bf16.msra.mxu0 %v1117_v18  ;;  %v4147_v18 = vld [vmem:[%s5270_s8 + $0x5c] ss:$36 sps:$4 sm:$0xff]   ;;  %v4148_v34 = vld [vmem:[%s5270_s8 + $0x90] ss:$36 sps:$4 sm:$0xff]  }
 0x227   :  { %v1111_v44 = vpack.c.bf16 %v991_v42, %v987_v36  ;;  %v1113_v45 = vpack.c.bf16 %v1044_v43, %v1040_v37  ;;  %3719 = vmatprep.subr.bf16.mxu0 %v1109_v20  ;;  %v4151_v35 = vld [vmem:[%s5270_s8 + $0xa0] ss:$36 sps:$4 sm:$0xff]   ;;  %2295 = vmatpush1.bf16.msra.mxu1 %v4148_v34  ;;  %v4159_v37 = vld [vmem:[%s5270_s8 + $0xec] ss:$36 sps:$4 sm:$0xff]   ;;  %v4154_v38 = vld [vmem:[%s5270_s8 + $0xd8] ss:$36 sps:$4 sm:$0xff]  }
 0x228   :  { %v4156_v36 = vld [vmem:[%s5270_s8 + $0xdc] ss:$36 sps:$4 sm:$0xff]   ;;  %v4157_v39 = vld [vmem:[%s5270_s8 + $0xe8] ss:$36 sps:$4 sm:$0xff]   ;;  %v4163_v43 = vld [vmem:[%s5270_s8 + $0x130] ss:$36 sps:$4 sm:$0xff]  }
 0x229   :  { %2296 = vmatprep.subr.bf16.mxu1 %v4156_v36  ;;  %v4160_v42 = vld [vmem:[%s5270_s8 + $0x120] ss:$36 sps:$4 sm:$0xff]  }
 0x22b   :  { %v995_v53 = vpop.f32.mrb[12].mxu1  ;;  %v1048_v54 = vpop.f32.mrb[28].mxu0  ;;  %2297 = vmatpush1.bf16.msra.mxu1 %v4154_v38 }
 0x22c   :  { %v997_v55 = vpop.f32.mrb[13].mxu1  ;;  %v1050_v56 = vpop.f32.mrb[29].mxu0 }
 0x22d   :  { %v999_v57 = vpop.f32.mrb[14].mxu1  ;;  %v1052_v58 = vpop.f32.mrb[30].mxu0  ;;  %3716 = vmatmul.mubr.msk.bf16.vlgmr.msra.gmra.mrb[32].mxu0 %vm1143_vm3, %v4794_v46 }
 0x22e   :  { %v1119_v59 = vpack.c.bf16 %v999_v57, %v995_v53  ;;  %v1121_v61 = vpack.c.bf16 %v1052_v58, %v1048_v54  ;;  %v1001_v63 = vpop.f32.mrb[15].mxu1  ;;  %v1054_v1 = vpop.f32.mrb[31].mxu0  ;;  %3720 = vmatpush3.bf16.msra.mxu0 %v1109_v20  ;;  %3723 = vmatprep.mubr.msk.bf16.mxu0 %vm1143_vm3, %v4799_v52  ;;  %v4864_v20 = vld [vmem:[%s5266_s4 + $0x78] sm:$0xff]   ;;  %v4166_v53 = vld [vmem:[%s5270_s8 + $0x168] ss:$36 sps:$4 sm:$0xff]  }
 0x22f   :  { %v1120_v4 = vpack.c.bf16 %v1001_v63, %v997_v55  ;;  %v1122_v5 = vpack.c.bf16 %v1054_v1, %v1050_v56  ;;  %3721 = vmatprep.subr.bf16.mxu0 %v1118_v27  ;;  %v4169_v54 = vld [vmem:[%s5270_s8 + $0x178] ss:$36 sps:$4 sm:$0xff]   ;;  %v4177_v56 = vld [vmem:[%s5270_s8 + $0x1c4] ss:$36 sps:$4 sm:$0xff]   ;;  %v4172_v57 = vld [vmem:[%s5270_s8 + $0x1b0] ss:$36 sps:$4 sm:$0xff]  }
 0x230   :  { %v4174_v55 = vld [vmem:[%s5270_s8 + $0x1b4] ss:$36 sps:$4 sm:$0xff]   ;;  %v4175_v58 = vld [vmem:[%s5270_s8 + $0x1c0] ss:$36 sps:$4 sm:$0xff]   ;;  %v4181_v1 = vld [vmem:[%s5270_s8 + $0x208] ss:$36 sps:$4 sm:$0xff]  }
 0x231   :  { %v4178_v63 = vld [vmem:[%s5270_s8 + $0x1f8] ss:$36 sps:$4 sm:$0xff]  }
 0x232   :  { %3722 = vmatpush3.bf16.msra.mxu0 %v1118_v27  ;;  %v4153_v27 = vld [vmem:[%s5270_s8 + $0xa4] ss:$36 sps:$4 sm:$0xff]  }
 0x233   :  { %3727 = vmatprep.subr.bf16.mxu0 %v1110_v40 }
 0x239   :  { %3724 = vmatmul.mubr.msk.bf16.vlgmr.msra.gmra.mrb[32].mxu0 %vm1143_vm3, %v4808_v7 }
 0x23a   :  { %3728 = vmatpush3.bf16.msra.mxu0 %v1110_v40  ;;  %3731 = vmatprep.mubr.msk.bf16.mxu0 %vm1143_vm3, %v4813_v8  ;;  %v4162_v40 = vld [vmem:[%s5270_s8 + $0x124] ss:$36 sps:$4 sm:$0xff]  }
 0x23b   :  { %3729 = vmatprep.subr.bf16.mxu0 %v1119_v59  ;;  %2298 = vmatprep.subr.bf16.mxu1 %v4162_v40 }
 0x23c   :  { %2299 = vmatpush1.bf16.msra.mxu1 %v4160_v42 }
 0x23e   :  { %3730 = vmatpush3.bf16.msra.mxu0 %v1119_v59  ;;  %v4180_v59 = vld [vmem:[%s5270_s8 + $0x1fc] ss:$36 sps:$4 sm:$0xff]  }
 0x23f   :  { %3735 = vmatprep.subr.bf16.mxu0 %v1111_v44 }
 0x243   :  { %v3693_v13 = vpop.f32.mrb[16].mxu1 }
 0x244   :  { %v1091_v15 = vpop.f32.mrb[17].mxu1 }
 0x245   :  { %v3694_v51 = vpop.f32.mrb[18].mxu1  ;;  %3732 = vmatmul.mubr.msk.bf16.vlgmr.msra.gmra.mrb[32].mxu0 %vm1143_vm3, %v4822_v9 }
 0x246   :  { %v1123_v3 = vpack.c.bf16 %v3694_v51, %v3693_v13  ;;  %v1094_v16 = vpop.f32.mrb[19].mxu1  ;;  %3736 = vmatpush3.bf16.msra.mxu0 %v1111_v44  ;;  %3739 = vmatprep.mubr.msk.bf16.mxu0 %vm1143_vm3, %v4827_v11  ;;  %v4168_v44 = vld [vmem:[%s5270_s8 + $0x16c] ss:$36 sps:$4 sm:$0xff]  }
 0x247   :  { %v1114_v17 = vpack.c.bf16 %v1094_v16, %v1091_v15  ;;  %3737 = vmatprep.subr.bf16.mxu0 %v1120_v4  ;;  %2300 = vmatprep.subr.bf16.mxu1 %v4168_v44 }
 0x248   :  { %2301 = vmatpush1.bf16.msra.mxu1 %v4166_v53 }
 0x249   :  { %2302 = vmatprep.subr.bf16.mxu1 %v4174_v55 }
 0x24a   :  { %3738 = vmatpush3.bf16.msra.mxu0 %v1120_v4  ;;  %v4186_v4 = vld [vmem:[%s5270_s8 + $0xc] ss:$36 sps:$4 sm:$0xff]  }
 0x24b   :  { %3743 = vmatprep.subr.bf16.mxu0 %v1112_v41 }
 0x24c   :  { %2303 = vmatpush1.bf16.msra.mxu1 %v4172_v57 }
 0x24d   :  { %2304 = vmatprep.subr.bf16.mxu1 %v4180_v59 }
 0x250   :  { %2305 = vmatpush1.bf16.msra.mxu1 %v4178_v63  ;;  %v1782_v63 = vld [vmem:[%s5268_s6] sm:$0x1] }
 0x251   :  { %3740 = vmatmul.mubr.msk.bf16.vlgmr.msra.gmra.mrb[32].mxu0 %vm1143_vm3, %v4836_v49  ;;  %2343 = vmatprep.subr.bf16.mxu1 %v4186_v4 }
 0x252   :  { %3744 = vmatpush3.bf16.msra.mxu0 %v1112_v41  ;;  %3747 = vmatprep.mubr.msk.bf16.mxu0 %vm1143_vm3, %v4841_v62  ;;  %v4165_v41 = vld [vmem:[%s5270_s8 + $0x134] ss:$36 sps:$4 sm:$0xff]  }
 0x253   :  { %3745 = vmatprep.subr.bf16.mxu0 %v1121_v61 }
 0x256   :  { %3746 = vmatpush3.bf16.msra.mxu0 %v1121_v61  ;;  %v4183_v61 = vld [vmem:[%s5270_s8 + $0x20c] ss:$36 sps:$4 sm:$0xff]  }
 0x257   :  { %3751 = vmatprep.subr.bf16.mxu0 %v1113_v45 }
 0x25d   :  { %3748 = vmatmul.mubr.msk.bf16.vlgmr.msra.gmra.mrb[32].mxu0 %vm1143_vm3, %v4850_v19 }
 0x25e   :  { %3752 = vmatpush3.bf16.msra.mxu0 %v1113_v45  ;;  %3755 = vmatprep.mubr.msk.bf16.mxu0 %vm1143_vm3, %v4855_v14  ;;  %v4171_v45 = vld [vmem:[%s5270_s8 + $0x17c] ss:$36 sps:$4 sm:$0xff]  }
 0x25f   :  { %3753 = vmatprep.subr.bf16.mxu0 %v1122_v5 }
 0x262   :  { %3754 = vmatpush3.bf16.msra.mxu0 %v1122_v5  ;;  %v4985_v5 = vld [vmem:[%s5270_s8 + $0x20] ss:$36 sps:$4 sm:$0xff]  }
 0x263   :  { %3759 = vmatprep.subr.bf16.mxu0 %v1114_v17 }
 0x269   :  { %3756 = vmatmul.mubr.msk.bf16.vlgmr.msra.gmra.mrb[32].mxu0 %vm1143_vm3, %v4864_v20 }
 0x26a   :  { %3760 = vmatpush3.bf16.msra.mxu0 %v1114_v17  ;;  %3763 = vmatprep.mubr.msk.bf16.mxu0 %vm1143_vm3, %v4869_v48 }
 0x26b   :  { %3761 = vmatprep.subr.bf16.mxu0 %v1123_v3 }
 0x26e   :  { %3762 = vmatpush3.bf16.msra.mxu0 %v1123_v3 }
 0x26f   :  { %2396 = vmatprep.subr.bf16.mxu0 %v4141_v60 }
 0x275   :  { %3764 = vmatmul.mubr.msk.bf16.vlgmr.msra.gmra.mrb[32].mxu0 %vm1143_vm3, %v4878_v50 }
 0x276   :  { %2428 = vmatprep.mubr.bf16.mxu0 %v4271_v47  ;;  %2397 = vmatpush1.bf16.msra.mxu0 %v4139_v12 }
 0x277   :  { %2398 = vmatprep.subr.bf16.mxu0 %v4147_v18 }
 0x27a   :  { %2399 = vmatpush1.bf16.msra.mxu0 %v4145_v25 }
 0x27b   :  { %2400 = vmatprep.subr.bf16.mxu0 %v4153_v27 }
 0x27e   :  { %2401 = vmatpush1.bf16.msra.mxu0 %v4151_v35 }
 0x27f   :  { %2402 = vmatprep.subr.bf16.mxu0 %v4159_v37 }
 0x282   :  { %2403 = vmatpush1.bf16.msra.mxu0 %v4157_v39 }
 0x283   :  { %2404 = vmatprep.subr.bf16.mxu0 %v4165_v41 }
 0x286   :  { %2405 = vmatpush1.bf16.msra.mxu0 %v4163_v43 }
 0x287   :  { %2406 = vmatprep.subr.bf16.mxu0 %v4171_v45 }
 0x28a   :  { %2407 = vmatpush1.bf16.msra.mxu0 %v4169_v54 }
 0x28b   :  { %2408 = vmatprep.subr.bf16.mxu0 %v4177_v56 }
 0x28e   :  { %2409 = vmatpush1.bf16.msra.mxu0 %v4175_v58 }
 0x28f   :  { %2410 = vmatprep.subr.bf16.mxu0 %v4183_v61 }
 0x292   :  { %2411 = vmatpush1.bf16.msra.mxu0 %v4181_v1 }
 0x293   :  { %3767 = vmatprep.subr.bf16.mxu0 %v4985_v5 }
 0x348   :  { %v3765_v13 = vpop.f32.mrb[32].mxu0 }
 0x349   :  { %v1763_v15 = vpop.f32.mrb[33].mxu0  ;;  %v1796_v60 = vmul.f32 %v3765_v13, %v3765_v13 }
 0x34a   :  { %v3766_v51 = vpop.f32.mrb[34].mxu0  ;;  %v1794_v16 = vmul.f32 %v1763_v15, %v1763_v15 }
 0x34b   :  { %v1766_v3 = vpop.f32.mrb[35].mxu0  ;;  %v1797_v23 = vmul.f32 %v3766_v51, %v3766_v51 }
 0x34c   :  { %v1784_v17 = vadd.f32 %v1766_v3, %v1763_v15  ;;  %v1795_v21 = vmul.f32 %v1766_v3, %v1766_v3 }
 0x34e   :  { %v1785_v2 = vadd.f32 %v3765_v13, %v1784_v17  ;;  %v1798_v12 = vadd.f32 %v1795_v21, %v1794_v16  ;;  %v3440_v17 = vld [vmem:[%s5269_s7] ss:$0 sm:$0xff] }
 0x350   :  { %v1786_v18 = vadd.f32 %v3766_v51, %v1785_v2  ;;  %v1799_v24 = vadd.f32 %v1798_v12, %v1796_v60 }
 0x352   :  { %v1787_v25 = vrot.slane %v1786_v18, 4  ;;  %v1800_v26 = vadd.f32 %v1799_v24, %v1797_v23 }
 0x354   :  { %v1788_v27 = vadd.f32 %v1787_v25, %v1786_v18  ;;  %v1801_v34 = vrot.slane %v1800_v26, 4 }
 0x356   :  { %v1789_v35 = vrot.slane %v1788_v27, 2  ;;  %v1802_v36 = vadd.f32 %v1801_v34, %v1800_v26  ;;  %v4184_v26 = vld [vmem:[%s5270_s8 + $0x8] ss:$36 sps:$4 sm:$0xff]   ;;  %v4190_v34 = vld [vmem:[%s5270_s8 + $0x54] ss:$36 sps:$4 sm:$0xff]  }
 0x358   :  { %v1790_v37 = vadd.f32 %v1789_v35, %v1788_v27  ;;  %v1803_v38 = vrot.slane %v1802_v36, 2  ;;  %v4191_v35 = vld [vmem:[%s5270_s8 + $0x68] ss:$36 sps:$4 sm:$0xff]  }
 0x35a   :  { %v1791_v39 = vrot.slane %v1790_v37, 1  ;;  %v1804_v40 = vadd.f32 %v1803_v38, %v1802_v36  ;;  %v4194_v38 = vld [vmem:[%s5270_s8 + $0x9c] ss:$36 sps:$4 sm:$0xff]  }
 0x35c   :  { %v1792_v41 = vadd.f32 %v1791_v39, %v1790_v37  ;;  %v1805_v42 = vrot.slane %v1804_v40, 1  ;;  %v4188_v37 = vld [vmem:[%s5270_s8 + $0x50] ss:$36 sps:$4 sm:$0xff]  }
 0x35d   :  { %v4195_v39 = vld [vmem:[%s5270_s8 + $0xb0] ss:$36 sps:$4 sm:$0xff]  }
 0x35e   :  { %v1793_v43 = vmul.f32 0.03125, %v1792_v41  ;;  %v1806_v44 = vadd.f32 %v1805_v42, %v1804_v40  ;;  %v4198_v40 = vld [vmem:[%s5270_s8 + $0xe4] ss:$36 sps:$4 sm:$0xff]   ;;  %v4199_v41 = vld [vmem:[%s5270_s8 + $0xf8] ss:$36 sps:$4 sm:$0xff]  }
 0x35f   :  { %v4196_v42 = vld [vmem:[%s5270_s8 + $0xe0] ss:$36 sps:$4 sm:$0xff]  }
 0x360   :  { %v1807_v45 = vmul.f32 0.03125, %v1806_v44  ;;  %v1808_v53 = vmul.f32 %v1793_v43, %v1793_v43  ;;  %v1811_v54 = vsub.f32 %v1763_v15, %v1793_v43  ;;  %v1812_v55 = vsub.f32 %v1766_v3, %v1793_v43  ;;  %v4203_v44 = vld [vmem:[%s5270_s8 + $0x140] ss:$36 sps:$4 sm:$0xff]  }
 0x361   :  { %v1813_v56 = vsub.f32 %v3765_v13, %v1793_v43  ;;  %v1814_v57 = vsub.f32 %v3766_v51, %v1793_v43  ;;  %v4202_v43 = vld [vmem:[%s5270_s8 + $0x12c] ss:$36 sps:$4 sm:$0xff]  }
 0x362   :  { %v1809_v58 = vsub.f32 %v1807_v45, %v1808_v53  ;;  %v4200_v45 = vld [vmem:[%s5270_s8 + $0x128] ss:$36 sps:$4 sm:$0xff]   ;;  %v4206_v53 = vld [vmem:[%s5270_s8 + $0x174] ss:$36 sps:$4 sm:$0xff]  }
 0x364   :  { %v1810_v59 = vmax.f32 %v1809_v58, 0.0  ;;  %v4208_v58 = vld [vmem:[%s5270_s8 + $0x1b8] ss:$36 sps:$4 sm:$0xff]  }
 0x366   :  { %v1815_v61 = vadd.f32 1e-05, %v1810_v59  ;;  %v4214_v59 = vld [vmem:[%s5270_s8 + $0x204] ss:$36 sps:$4 sm:$0xff]  }
 0x368   :  { %4242 = vrsqrt.f32 %v1815_v61  ;;  %v4215_v61 = vld [vmem:[%s5270_s8 + $0x218] ss:$36 sps:$4 sm:$0xff]  }
 0x372   :  { %v4243_v1 = vpop.eup %4242 }
 0x373   :  { %v1817_v4 = vmul.f32 %v4243_v1, %v1782_v63  ;;  %v4212_v63 = vld [vmem:[%s5270_s8 + $0x200] ss:$36 sps:$4 sm:$0xff]  }
 0x374   :  { %v4218_v1 = vld [vmem:[%s5270_s8 + $0x1c] ss:$36 sps:$4 sm:$0xff]  }
 0x375   :  { %v1821_v16 = vrot.slane %v1817_v4, %v4603_v22  ;;  %v4216_v4 = vld [vmem:[%s5270_s8 + $0x18] ss:$36 sps:$4 sm:$0xff]  }
 0x377   :  { %v1822_v15 = vmul.f32 %v1821_v16, %v1811_v54  ;;  %v1823_v3 = vmul.f32 %v1821_v16, %v1812_v55  ;;  %v1824_v13 = vmul.f32 %v1821_v16, %v1813_v56  ;;  %v1825_v51 = vmul.f32 %v1821_v16, %v1814_v57  ;;  %v4207_v54 = vld [vmem:[%s5270_s8 + $0x188] ss:$36 sps:$4 sm:$0xff]   ;;  %v4204_v55 = vld [vmem:[%s5270_s8 + $0x170] ss:$36 sps:$4 sm:$0xff]   ;;  %v4210_v56 = vld [vmem:[%s5270_s8 + $0x1bc] ss:$36 sps:$4 sm:$0xff]  }
 0x378   :  { %v4211_v57 = vld [vmem:[%s5270_s8 + $0x1d0] ss:$36 sps:$4 sm:$0xff]   ;;  %v4221_v16 = vld [vmem:[%s5270_s8 + $0x64] ss:$36 sps:$4 sm:$0xff]  }
 0x379   :  { %v1832_v21 = vadd.f32 %v3440_v17, %v1822_v15  ;;  %v1833_v60 = vadd.f32 %v3440_v17, %v1823_v3  ;;  %v1834_v2 = vadd.f32 %v3440_v17, %v1824_v13  ;;  %v1835_v12 = vadd.f32 %v3440_v17, %v1825_v51  ;;  %v4219_v17 = vld [vmem:[%s5270_s8 + $0x60] ss:$36 sps:$4 sm:$0xff]   ;;  %v4224_v15 = vld [vmem:[%s5270_s8 + $0xac] ss:$36 sps:$4 sm:$0xff]   ;;  %v4227_v13 = vld [vmem:[%s5270_s8 + $0xf4] ss:$36 sps:$4 sm:$0xff]  }
 0x37a   :  { %v4222_v3 = vld [vmem:[%s5270_s8 + $0xa8] ss:$36 sps:$4 sm:$0xff]   ;;  %v4225_v51 = vld [vmem:[%s5270_s8 + $0xf0] ss:$36 sps:$4 sm:$0xff]  }
 0x37b   :  { %v1836_v23 = vmax.f32 %v1832_v21, 0.0  ;;  %v1837_v18 = vmax.f32 %v1833_v60, 0.0  ;;  %v1838_v24 = vmax.f32 %v1834_v2, 0.0  ;;  %v1839_v25 = vmax.f32 %v1835_v12, 0.0  ;;  %v4228_v21 = vld [vmem:[%s5270_s8 + $0x138] ss:$36 sps:$4 sm:$0xff]  }
 0x37c   :  { %v4233_v60 = vld [vmem:[%s5270_s8 + $0x184] ss:$36 sps:$4 sm:$0xff]   ;;  %v4236_v12 = vld [vmem:[%s5270_s8 + $0x1cc] ss:$36 sps:$4 sm:$0xff]  }
 0x37d   :  { %v4998_v27 = vpack.c.bf16 %v1837_v18, %v1836_v23  ;;  %v5006_v36 = vpack.c.bf16 %v1839_v25, %v1838_v24  ;;  %v4231_v2 = vld [vmem:[%s5270_s8 + $0x180] ss:$36 sps:$4 sm:$0xff]   ;;  %v4234_v23 = vld [vmem:[%s5270_s8 + $0x1c8] ss:$36 sps:$4 sm:$0xff]   ;;  %v4239_v18 = vld [vmem:[%s5270_s8 + $0x214] ss:$36 sps:$4 sm:$0xff]  }
 0x37e   :  { %v4237_v24 = vld [vmem:[%s5270_s8 + $0x210] ss:$36 sps:$4 sm:$0xff]  }
 0x37f   :  { %2323 = vmatmul.mubr.bf16.vlgmr.msra.gmra.mrb[20].mxu1 %v4998_v27  ;;  %2429 = vmatmul.mubr.bf16.vlgmr.msra.gmra.mrb[36].mxu0 %v4998_v27 }
 0x380   :  { %2344 = vmatpush1.bf16.msra.mxu1 %v4184_v26  ;;  %3768 = vmatpush3.bf16.msra.mxu0 %v4985_v5  ;;  %v4192_v5 = vld [vmem:[%s5270_s8 + $0x98] ss:$36 sps:$4 sm:$0xff]  }
 0x381   :  { %2345 = vmatprep.subr.bf16.mxu1 %v4190_v34  ;;  %3769 = vmatprep.subr.bf16.mxu0 %v4191_v35 }
 0x382   :  { %2332 = vmatprep.mubr.bf16.mxu1 %v4271_v47  ;;  %2438 = vmatprep.mubr.bf16.mxu0 %v4271_v47 }
 0x384   :  { %2346 = vmatpush1.bf16.msra.mxu1 %v4188_v37  ;;  %3770 = vmatpush3.bf16.msra.mxu0 %v4191_v35 }
 0x385   :  { %2347 = vmatprep.subr.bf16.mxu1 %v4194_v38  ;;  %3771 = vmatprep.subr.bf16.mxu0 %v4195_v39 }
 0x387   :  { %2333 = vmatmul.mubr.bf16.gmra.mrb[24].mxu1 %v5006_v36  ;;  %2439 = vmatmul.mubr.bf16.gmra.mrb[40].mxu0 %v5006_v36 }
 0x388   :  { %2348 = vmatpush1.bf16.msra.mxu1 %v4192_v5  ;;  %3772 = vmatpush3.bf16.msra.mxu0 %v4195_v39 }
 0x389   :  { %3783 = vmatprep.mubr.bf16.mxu0 %v4998_v27  ;;  %2349 = vmatprep.subr.bf16.mxu1 %v4198_v40 }
 0x38a   :  { %3773 = vmatprep.subr.bf16.mxu0 %v4199_v41  ;;  %2375 = vmatprep.mubr.bf16.mxu1 %v4271_v47 }
 0x38c   :  { %2350 = vmatpush1.bf16.msra.mxu1 %v4196_v42  ;;  %3774 = vmatpush3.bf16.msra.mxu0 %v4199_v41 }
 0x38d   :  { %2351 = vmatprep.subr.bf16.mxu1 %v4202_v43  ;;  %3775 = vmatprep.subr.bf16.mxu0 %v4203_v44 }
 0x390   :  { %2352 = vmatpush1.bf16.msra.mxu1 %v4200_v45  ;;  %3776 = vmatpush3.bf16.msra.mxu0 %v4203_v44 }
 0x391   :  { %2353 = vmatprep.subr.bf16.mxu1 %v4206_v53  ;;  %3777 = vmatprep.subr.bf16.mxu0 %v4207_v54 }
 0x394   :  { %2354 = vmatpush1.bf16.msra.mxu1 %v4204_v55  ;;  %3778 = vmatpush3.bf16.msra.mxu0 %v4207_v54 }
 0x395   :  { %2355 = vmatprep.subr.bf16.mxu1 %v4210_v56  ;;  %3779 = vmatprep.subr.bf16.mxu0 %v4211_v57 }
 0x398   :  { %2356 = vmatpush1.bf16.msra.mxu1 %v4208_v58  ;;  %3780 = vmatpush3.bf16.msra.mxu0 %v4211_v57 }
 0x399   :  { %2357 = vmatprep.subr.bf16.mxu1 %v4214_v59  ;;  %3781 = vmatprep.subr.bf16.mxu0 %v4215_v61 }
 0x39c   :  { %2358 = vmatpush1.bf16.msra.mxu1 %v4212_v63  ;;  %3782 = vmatpush3.bf16.msra.mxu0 %v4215_v61 }
 0x39d   :  { %2449 = vmatprep.subr.bf16.mxu1 %v4218_v1 }
 0x39f   :  { %2376 = vmatmul.mubr.bf16.vlgmr.msra.gmra.mrb[28].mxu1 %v4998_v27  ;;  %3784 = vmatmul.mubr.bf16.vlgmr.msra.gmra.mrb[44].mxu0 %v5006_v36 }
 0x3a0   :  { %2450 = vmatpush1.bf16.msra.mxu1 %v4216_v4  ;;  %2385 = vmatprep.mubr.bf16.mxu1 %v4271_v47 }
 0x3a1   :  { %2451 = vmatprep.subr.bf16.mxu1 %v4221_v16  ;;  %3791 = vmatprep.mubr.msk.bf16.mxu0 %vm1143_vm3, %v4759_v10  ;;  %v4230_v10 = vld [vmem:[%s5270_s8 + $0x13c] ss:$36 sps:$4 sm:$0xff]  }
 0x3a4   :  { %2452 = vmatpush1.bf16.msra.mxu1 %v4219_v17 }
 0x3a5   :  { %2453 = vmatprep.subr.bf16.mxu1 %v4224_v15 }
 0x3a7   :  { %2386 = vmatmul.mubr.bf16.gmra.mrb[32].mxu1 %v5006_v36 }
 0x3a8   :  { %2454 = vmatpush1.bf16.msra.mxu1 %v4222_v3  ;;  %2481 = vmatprep.mubr.bf16.mxu1 %v4271_v47 }
 0x3a9   :  { %2455 = vmatprep.subr.bf16.mxu1 %v4227_v13 }
 0x3ac   :  { %2456 = vmatpush1.bf16.msra.mxu1 %v4225_v51 }
 0x3ad   :  { %2457 = vmatprep.subr.bf16.mxu1 %v4230_v10 }
 0x3b0   :  { %2458 = vmatpush1.bf16.msra.mxu1 %v4228_v21 }
 0x3b1   :  { %2459 = vmatprep.subr.bf16.mxu1 %v4233_v60 }
 0x3b4   :  { %2460 = vmatpush1.bf16.msra.mxu1 %v4231_v2 }
 0x3b5   :  { %2461 = vmatprep.subr.bf16.mxu1 %v4236_v12 }
 0x3b8   :  { %2462 = vmatpush1.bf16.msra.mxu1 %v4234_v23 }
 0x3b9   :  { %2463 = vmatprep.subr.bf16.mxu1 %v4239_v18 }
 0x3bc   :  { %2464 = vmatpush1.bf16.msra.mxu1 %v4237_v24 }
 0x3bf   :  { %2482 = vmatmul.mubr.bf16.vlgmr.msra.gmra.mrb[36].mxu1 %v4998_v27 }
 0x3c0   :  { %2491 = vmatprep.mubr.bf16.mxu1 %v4271_v47 }
 0x3c7   :  { %2492 = vmatmul.mubr.bf16.gmra.mrb[40].mxu1 %v5006_v36 }
 0x3c8   :  { %3799 = vmatprep.mubr.msk.bf16.mxu1 %vm1143_vm3, %v4771_v29 }
 0x452   :  { %v2324_v25 = vpop.f32.mrb[20].mxu1  ;;  %v2430_v26 = vpop.f32.mrb[36].mxu0 }
 0x453   :  { %v2326_v34 = vpop.f32.mrb[21].mxu1  ;;  %v2432_v35 = vpop.f32.mrb[37].mxu0 }
 0x454   :  { %v2328_v37 = vpop.f32.mrb[22].mxu1  ;;  %v2434_v38 = vpop.f32.mrb[38].mxu0 }
 0x455   :  { %v2551_v39 = vpack.c.bf16 %v2328_v37, %v2324_v25  ;;  %v2555_v5 = vpack.c.bf16 %v2434_v38, %v2430_v26  ;;  %v2330_v40 = vpop.f32.mrb[23].mxu1  ;;  %v2436_v41 = vpop.f32.mrb[39].mxu0 }
 0x456   :  { %v2552_v42 = vpack.c.bf16 %v2330_v40, %v2326_v34  ;;  %v5134_v43 = vpack.c.bf16 %v2436_v41, %v2432_v35 }
 0x457   :  { %3795 = vmatprep.subr.bf16.mxu1 %v2551_v39 }
 0x458   :  { %3787 = vmatprep.subr.bf16.mxu0 %v2552_v42  ;;  %3796 = vmatpush3.bf16.msra.mxu1 %v2551_v39 }
 0x459   :  { %3788 = vmatpush3.bf16.msra.mxu0 %v2552_v42 }
 0x45a   :  { %v2334_v47 = vpop.f32.mrb[24].mxu1  ;;  %v2440_v27 = vpop.f32.mrb[40].mxu0 }
 0x45b   :  { %v2336_v29 = vpop.f32.mrb[25].mxu1  ;;  %v2442_v36 = vpop.f32.mrb[41].mxu0 }
 0x45c   :  { %v2338_v44 = vpop.f32.mrb[26].mxu1  ;;  %v2444_v45 = vpop.f32.mrb[42].mxu0 }
 0x45d   :  { %v2560_v53 = vpack.c.bf16 %v2338_v44, %v2334_v47  ;;  %v2564_v54 = vpack.c.bf16 %v2444_v45, %v2440_v27  ;;  %v2340_v55 = vpop.f32.mrb[27].mxu1  ;;  %v2446_v56 = vpop.f32.mrb[43].mxu0 }
 0x45e   :  { %v2561_v57 = vpack.c.bf16 %v2340_v55, %v2336_v29  ;;  %v2565_v58 = vpack.c.bf16 %v2446_v56, %v2442_v36 }
 0x45f   :  { %3797 = vmatprep.subr.bf16.mxu1 %v2560_v53 }
 0x460   :  { %3789 = vmatprep.subr.bf16.mxu0 %v2561_v57  ;;  %3798 = vmatpush3.bf16.msra.mxu1 %v2560_v53 }
 0x461   :  { %3790 = vmatpush3.bf16.msra.mxu0 %v2561_v57 }
 0x463   :  { %3800 = vmatmul.mubr.msk.bf16.vlgmr.msra.gmra.mrb[44].mxu1 %vm1143_vm3, %v4780_v32 }
 0x464   :  { %3807 = vmatprep.mubr.msk.bf16.mxu1 %vm1143_vm3, %v4785_v33  ;;  %3792 = vmatmul.mubr.msk.bf16.vlgmr.msra.gmra.mrb[48].mxu0 %vm1143_vm3, %v4766_v28 }
 0x472   :  { %v2377_v59 = vpop.f32.mrb[28].mxu1  ;;  %v3785_v61 = vpop.f32.mrb[44].mxu0 }
 0x473   :  { %v2379_v63 = vpop.f32.mrb[29].mxu1  ;;  %v2536_v1 = vpop.f32.mrb[45].mxu0 }
 0x474   :  { %v2381_v4 = vpop.f32.mrb[30].mxu1  ;;  %v3786_v16 = vpop.f32.mrb[46].mxu0 }
 0x475   :  { %v2553_v17 = vpack.c.bf16 %v2381_v4, %v2377_v59  ;;  %v2568_v15 = vpack.c.bf16 %v3786_v16, %v3785_v61  ;;  %v2383_v3 = vpop.f32.mrb[31].mxu1  ;;  %v2539_v13 = vpop.f32.mrb[47].mxu0 }
 0x476   :  { %v2554_v51 = vpack.c.bf16 %v2383_v3, %v2379_v63  ;;  %v2559_v10 = vpack.c.bf16 %v2539_v13, %v2536_v1 }
 0x477   :  { %3803 = vmatprep.subr.bf16.mxu1 %v2553_v17 }
 0x478   :  { %3804 = vmatpush3.bf16.msra.mxu1 %v2553_v17 }
 0x47a   :  { %v2387_v32 = vpop.f32.mrb[32].mxu1 }
 0x47b   :  { %v2389_v21 = vpop.f32.mrb[33].mxu1 }
 0x47c   :  { %v2391_v33 = vpop.f32.mrb[34].mxu1 }
 0x47d   :  { %v2562_v60 = vpack.c.bf16 %v2391_v33, %v2387_v32  ;;  %v2393_v2 = vpop.f32.mrb[35].mxu1 }
 0x47e   :  { %v2563_v28 = vpack.c.bf16 %v2393_v2, %v2389_v21 }
 0x47f   :  { %3805 = vmatprep.subr.bf16.mxu1 %v2562_v60 }
 0x480   :  { %3806 = vmatpush3.bf16.msra.mxu1 %v2562_v60 }
 0x481   :  { %3811 = vmatprep.subr.bf16.mxu1 %v2554_v51 }
 0x483   :  { %3808 = vmatmul.mubr.msk.bf16.vlgmr.msra.gmra.mrb[44].mxu1 %vm1143_vm3, %v4794_v46 }
 0x484   :  { %3812 = vmatpush3.bf16.msra.mxu1 %v2554_v51  ;;  %3815 = vmatprep.mubr.msk.bf16.mxu1 %vm1143_vm3, %v4799_v52 }
 0x485   :  { %3813 = vmatprep.subr.bf16.mxu1 %v2563_v28 }
 0x488   :  { %3814 = vmatpush3.bf16.msra.mxu1 %v2563_v28  ;;  %v3038_v28 = vld [vmem:[%s5271_s9] sm:$0x1] }
 0x489   :  { %3819 = vmatprep.subr.bf16.mxu1 %v2555_v5 }
 0x48f   :  { %3816 = vmatmul.mubr.msk.bf16.vlgmr.msra.gmra.mrb[44].mxu1 %vm1143_vm3, %v4808_v7 }
 0x490   :  { %3820 = vmatpush3.bf16.msra.mxu1 %v2555_v5  ;;  %3823 = vmatprep.mubr.msk.bf16.mxu1 %vm1143_vm3, %v4813_v8 }
 0x491   :  { %3821 = vmatprep.subr.bf16.mxu1 %v2564_v54 }
 0x492   :  { %v2483_v12 = vpop.f32.mrb[36].mxu1 }
 0x493   :  { %v2485_v23 = vpop.f32.mrb[37].mxu1 }
 0x494   :  { %3822 = vmatpush3.bf16.msra.mxu1 %v2564_v54  ;;  %v2487_v18 = vpop.f32.mrb[38].mxu1 }
 0x495   :  { %v2557_v46 = vpack.c.bf16 %v2487_v18, %v2483_v12  ;;  %3827 = vmatprep.subr.bf16.mxu1 %v5134_v43  ;;  %v2489_v24 = vpop.f32.mrb[39].mxu1 }
 0x496   :  { %v2558_v52 = vpack.c.bf16 %v2489_v24, %v2485_v23 }
 0x49a   :  { %v2493_v25 = vpop.f32.mrb[40].mxu1 }
 0x49b   :  { %v2495_v26 = vpop.f32.mrb[41].mxu1  ;;  %3824 = vmatmul.mubr.msk.bf16.vlgmr.msra.gmra.mrb[44].mxu1 %vm1143_vm3, %v4822_v9 }
 0x49c   :  { %3828 = vmatpush3.bf16.msra.mxu1 %v5134_v43  ;;  %v2497_v7 = vpop.f32.mrb[42].mxu1  ;;  %3831 = vmatprep.mubr.msk.bf16.mxu1 %vm1143_vm3, %v4827_v11 }
 0x49d   :  { %v2566_v8 = vpack.c.bf16 %v2497_v7, %v2493_v25  ;;  %3829 = vmatprep.subr.bf16.mxu1 %v2565_v58  ;;  %v2499_v34 = vpop.f32.mrb[43].mxu1 }
 0x49e   :  { %v2567_v35 = vpack.c.bf16 %v2499_v34, %v2495_v26 }
 0x4a0   :  { %3830 = vmatpush3.bf16.msra.mxu1 %v2565_v58 }
 0x4a1   :  { %3835 = vmatprep.subr.bf16.mxu1 %v2557_v46 }
 0x4a7   :  { %3832 = vmatmul.mubr.msk.bf16.vlgmr.msra.gmra.mrb[44].mxu1 %vm1143_vm3, %v4836_v49 }
 0x4a8   :  { %3836 = vmatpush3.bf16.msra.mxu1 %v2557_v46  ;;  %3839 = vmatprep.mubr.msk.bf16.mxu1 %vm1143_vm3, %v4841_v62  ;;  %v3531_v46 = vld [vmem:[%s5272_s10] ss:$0 sm:$0xff] }
 0x4a9   :  { %3837 = vmatprep.subr.bf16.mxu1 %v2566_v8 }
 0x4ac   :  { %3838 = vmatpush3.bf16.msra.mxu1 %v2566_v8 }
 0x4ad   :  { %3843 = vmatprep.subr.bf16.mxu1 %v2558_v52 }
 0x4b3   :  { %3840 = vmatmul.mubr.msk.bf16.vlgmr.msra.gmra.mrb[44].mxu1 %vm1143_vm3, %v4850_v19  ;;  %v4272_v19 = vmov 0.0|0.0  }
 0x4b4   :  { %3844 = vmatpush3.bf16.msra.mxu1 %v2558_v52  ;;  %3847 = vmatprep.mubr.msk.bf16.mxu1 %vm1143_vm3, %v4855_v14  ;;  %v4274_v14 = vmov 0.0  }
 0x4b5   :  { %3845 = vmatprep.subr.bf16.mxu1 %v2567_v35  ;;  %3905 = vmatprep.subr.bf16.mxu0 %v4272_v19 }
 0x4b6   :  { %3867 = vmatprep.mubr.msk.f32.mxu0 %vm4273_vm4, %v4274_v14 }
 0x4b8   :  { %3846 = vmatpush3.bf16.msra.mxu1 %v2567_v35 }
 0x4b9   :  { %3851 = vmatprep.subr.bf16.mxu1 %v2559_v10 }
 0x4bf   :  { %3848 = vmatmul.mubr.msk.bf16.vlgmr.msra.gmra.mrb[44].mxu1 %vm1143_vm3, %v4864_v20 }
 0x4c0   :  { %3852 = vmatpush3.bf16.msra.mxu1 %v2559_v10  ;;  %3855 = vmatprep.mubr.msk.bf16.mxu1 %vm1143_vm3, %v4869_v48 }
 0x4c1   :  { %3853 = vmatprep.subr.bf16.mxu1 %v2568_v15 }
 0x4c4   :  { %3854 = vmatpush3.bf16.msra.mxu1 %v2568_v15 }
 0x4cb   :  { %3856 = vmatmul.mubr.msk.bf16.vlgmr.msra.gmra.mrb[44].mxu1 %vm1143_vm3, %v4878_v50 }
 0x537   :  { %v3793_v9 = vpop.f32.mrb[48].mxu0 }
 0x538   :  { %v2603_v11 = vpop.f32.mrb[49].mxu0 }
 0x539   :  { %v3794_v49 = vpop.f32.mrb[50].mxu0 }
 0x53a   :  { %v2606_v62 = vpop.f32.mrb[51].mxu0 }
 0x59e   :  { %v3857_v20 = vpop.f32.mrb[44].mxu1 }
 0x59f   :  { %v3935_v37 = vadd.f32 %v3857_v20, %v3793_v9  ;;  %v3019_v48 = vpop.f32.mrb[45].mxu1 }
 0x5a0   :  { %v3936_v38 = vadd.f32 %v3019_v48, %v2603_v11  ;;  %v3858_v39 = vpop.f32.mrb[46].mxu1 }
 0x5a1   :  { %v3937_v5 = vadd.f32 %v3858_v39, %v3794_v49  ;;  %v3022_v40 = vpop.f32.mrb[47].mxu1  ;;  %v3052_v47 = vmul.f32 %v3935_v37, %v3935_v37 }
 0x5a2   :  { %v3938_v50 = vadd.f32 %v3022_v40, %v2606_v62  ;;  %v3050_v41 = vmul.f32 %v3936_v38, %v3936_v38  ;;  %v3177_v40 = vld [vmem:[%s5274_s12 + $0x18] sm:$0xff] }
 0x5a3   :  { %v3053_v36 = vmul.f32 %v3937_v5, %v3937_v5 }
 0x5a4   :  { %v3040_v42 = vadd.f32 %v3938_v50, %v3936_v38  ;;  %v3051_v43 = vmul.f32 %v3938_v50, %v3938_v50 }
 0x5a6   :  { %v3041_v27 = vadd.f32 %v3935_v37, %v3040_v42  ;;  %v3054_v29 = vadd.f32 %v3051_v43, %v3050_v41  ;;  %v3178_v41 = vld [vmem:[%s5274_s12 + $0x20] sm:$0xff]  ;;  %v3179_v42 = vld [vmem:[%s5274_s12 + $0x28] sm:$0xff] }
 0x5a7   :  { %v3918_v43 = vpack.c.bf16 %v3179_v42, %v3178_v41 }
 0x5a8   :  { %v3042_v44 = vadd.f32 %v3937_v5, %v3041_v27  ;;  %v3055_v45 = vadd.f32 %v3054_v29, %v3052_v47  ;;  %v3180_v47 = vld [vmem:[%s5274_s12 + $0x30] sm:$0xff]  ;;  %v3182_v29 = vld [vmem:[%s5274_s12 + $0x40] sm:$0xff] }
 0x5aa   :  { %v3043_v53 = vrot.slane %v3042_v44, 4  ;;  %v3056_v54 = vadd.f32 %v3055_v45, %v3053_v36  ;;  %v3183_v36 = vld [vmem:[%s5274_s12 + $0x48] sm:$0xff]  ;;  %v3184_v45 = vld [vmem:[%s5274_s12 + $0x50] sm:$0xff] }
 0x5ac   :  { %v3044_v55 = vadd.f32 %v3043_v53, %v3042_v44  ;;  %v3057_v56 = vrot.slane %v3056_v54, 4  ;;  %v3924_v44 = vpack.c.bf16 %v3183_v36, %v3182_v29  ;;  %v3185_v53 = vld [vmem:[%s5274_s12 + $0x58] sm:$0xff] }
 0x5ae   :  { %v3045_v57 = vrot.slane %v3044_v55, 2  ;;  %v3058_v58 = vadd.f32 %v3057_v56, %v3056_v54  ;;  %v3927_v54 = vpack.c.bf16 %v3185_v53, %v3184_v45  ;;  %v3187_v56 = vld [vmem:[%s5274_s12 + $0x68] sm:$0xff] }
 0x5b0   :  { %v3046_v59 = vadd.f32 %v3045_v57, %v3044_v55  ;;  %v3059_v61 = vrot.slane %v3058_v58, 2  ;;  %v3186_v55 = vld [vmem:[%s5274_s12 + $0x60] sm:$0xff] }
 0x5b1   :  { %v3930_v57 = vpack.c.bf16 %v3187_v56, %v3186_v55 }
 0x5b2   :  { %v3047_v63 = vrot.slane %v3046_v59, 1  ;;  %v3060_v1 = vadd.f32 %v3059_v61, %v3058_v58  ;;  %v3188_v58 = vld [vmem:[%s5274_s12 + $0x70] sm:$0xff] }
 0x5b4   :  { %v3048_v4 = vadd.f32 %v3047_v63, %v3046_v59  ;;  %v3061_v16 = vrot.slane %v3060_v1, 1  ;;  %v3189_v59 = vld [vmem:[%s5274_s12 + $0x78] sm:$0xff] }
 0x5b5   :  { %v3933_v61 = vpack.c.bf16 %v3189_v59, %v3188_v58 }
 0x5b6   :  { %v3049_v17 = vmul.f32 0.03125, %v3048_v4  ;;  %v3062_v15 = vadd.f32 %v3061_v16, %v3060_v1  ;;  %v3533_v4 = vld [vmem:[%s5275_s13] ss:$0 sm:$0xff] }
 0x5b8   :  { %v3063_v3 = vmul.f32 0.03125, %v3062_v15  ;;  %v3064_v13 = vmul.f32 %v3049_v17, %v3049_v17  ;;  %v3068_v51 = vsub.f32 %v3938_v50, %v3049_v17  ;;  %v3067_v10 = vsub.f32 %v3936_v38, %v3049_v17 }
 0x5b9   :  { %v3069_v32 = vsub.f32 %v3935_v37, %v3049_v17  ;;  %v3070_v21 = vsub.f32 %v3937_v5, %v3049_v17  ;;  %v3174_v5 = vld [vmem:[%s5274_s12] sm:$0xff] }
 0x5ba   :  { %v3065_v33 = vsub.f32 %v3063_v3, %v3064_v13 }
 0x5bc   :  { %v3066_v60 = vmax.f32 %v3065_v33, 0.0 }
 0x5be   :  { %v3071_v2 = vadd.f32 1e-05, %v3066_v60 }
 0x5c0   :  { %4244 = vrsqrt.f32 %v3071_v2 }
 0x5ca   :  { %v4245_v12 = vpop.eup %4244 }
 0x5cb   :  { %v3073_v23 = vmul.f32 %v4245_v12, %v3038_v28 }
 0x5cd   :  { %v3077_v18 = vrot.slane %v3073_v23, %v4603_v22 }
 0x5cf   :  { %v3079_v24 = vmul.f32 %v3077_v18, %v3068_v51  ;;  %v3078_v52 = vmul.f32 %v3077_v18, %v3067_v10  ;;  %v3080_v25 = vmul.f32 %v3077_v18, %v3069_v32  ;;  %v3081_v26 = vmul.f32 %v3077_v18, %v3070_v21 }
 0x5d1   :  { %v3089_v7 = vadd.f32 %v3531_v46, %v3079_v24  ;;  %v3088_v8 = vadd.f32 %v3531_v46, %v3078_v52  ;;  %v3090_v34 = vadd.f32 %v3531_v46, %v3080_v25  ;;  %v3091_v35 = vadd.f32 %v3531_v46, %v3081_v26 }
 0x5d3   :  { %v3092_v9 = vadd.f32 %v3088_v8, %v4611_v6  ;;  %v3093_v11 = vadd.f32 %v3089_v7, %v4609_v0  ;;  %v3094_v49 = vadd.f32 %v3090_v34, %v4645_v30  ;;  %v3095_v22 = vadd.f32 %v3091_v35, %v4647_v31  ;;  %v3175_v0 = vld [vmem:[%s5274_s12 + $0x8] sm:$0xff]  ;;  %v3100_v6 = vld [vmem:[%s5273_s11] sm:$0x3]  ;;  %v3176_v31 = vld [vmem:[%s5274_s12 + $0x10] sm:$0xff] }
 0x5d4   :  { %v3912_v30 = vpack.c.bf16 %v3175_v0, %v3174_v5  ;;  %v3915_v50 = vpack.c.bf16 %v3177_v40, %v3176_v31 }
 0x5d5   :  { %v3096_v62 = vmax.f32 %v3092_v9, 0.0  ;;  %v3097_v20 = vmax.f32 %v3093_v11, 0.0  ;;  %v3098_v37 = vmax.f32 %v3094_v49, 0.0  ;;  %v3099_v48 = vmax.f32 %v3095_v22, 0.0 }
 0x5d7   :  { %v3906_v38 = vpack.c.bf16 %v3097_v20, %v3096_v62  ;;  %v3909_v39 = vpack.c.bf16 %v3099_v48, %v3098_v37 }
 0x5d9   :  { %3907 = vmatpush3.bf16.msra.mxu0 %v3906_v38 }
 0x5da   :  { %3908 = vmatprep.subr.bf16.mxu0 %v4272_v19 }
 0x5dd   :  { %3910 = vmatpush3.bf16.msra.mxu0 %v3909_v39 }
 0x5de   :  { %3911 = vmatprep.subr.bf16.mxu0 %v4272_v19 }
 0x5e0   :  { %3868 = vmatmul.mubr.msk.f32.vlgmr.msra.gmra.mrb[52].mxu0 %vm1143_vm3, %v3100_v6 }
 0x5e1   :  { %3913 = vmatpush3.bf16.msra.mxu0 %v3912_v30  ;;  %3902 = vmatprep.mubr.msk.f32.mxu0 %vm4273_vm4, %v4274_v14  ;;  %v3181_v14 = vld [vmem:[%s5274_s12 + $0x38] sm:$0xff]  ;;  %s4246_s12 = scalar_lea.vmem %s3275_s18, 32 }
 0x5e2   :  { %3914 = vmatprep.subr.bf16.mxu0 %v4272_v19  ;;  %v3921_v27 = vpack.c.bf16 %v3181_v14, %v3180_v47  ;;  %p4247_p0 = scmp.ne.s32.totalorder %s3275_s18, %s4246_s12  ;;  %p4252_p2 = scmp.lt.s32.totalorder %s4246_s12, %s4246_s12 }
 0x5e4   :  { %p4253_p3 = por %p4252_p2, %p4251_p1 }
 0x5e5   :  { %3916 = vmatpush3.bf16.msra.mxu0 %v3915_v50 }
 0x5e6   :  { %3917 = vmatprep.subr.bf16.mxu0 %v4272_v19  ;;  %p4254_p4 = pnand %p4253_p3, %p4247_p0 }
 0x5e9   :  { %3919 = vmatpush3.bf16.msra.mxu0 %v3918_v43 }
 0x5ea   :  { %3920 = vmatprep.subr.bf16.mxu0 %v4272_v19 }
 0x5ed   :  { %3922 = vmatpush3.bf16.msra.mxu0 %v3921_v27 }
 0x5ee   :  { %3923 = vmatprep.subr.bf16.mxu0 %v4272_v19 }
 0x5f1   :  { %3925 = vmatpush3.bf16.msra.mxu0 %v3924_v44 }
 0x5f2   :  { %3926 = vmatprep.subr.bf16.mxu0 %v4272_v19 }
 0x5f5   :  { %3928 = vmatpush3.bf16.msra.mxu0 %v3927_v54 }
 0x5f6   :  { %3929 = vmatprep.subr.bf16.mxu0 %v4272_v19 }
 0x5f9   :  { %3931 = vmatpush3.bf16.msra.mxu0 %v3930_v57 }
 0x5fa   :  { %3932 = vmatprep.subr.bf16.mxu0 %v4272_v19 }
 0x5fd   :  { %3934 = vmatpush3.bf16.msra.mxu0 %v3933_v61 }
 0x6b3   :  { %v3170_v63 = vpop.f32.mrb[52].mxu0 }
 0x6b4   :  { %v3869_v1 = vpop.f32.mrb[53].mxu0  ;;  %3903 = vmatmul.mubr.f32.vlgmr.msra.gmra.mrb[54].mxu0 %v3170_v63 }
 0x787   :  { %v3263_v16 = vpop.f32.mrb[54].mxu0 }
 0x788   :  { %v3264_v17 = vadd.f32 %v3533_v4, %v3263_v16  ;;  %v3904_v15 = vpop.f32.mrb[55].mxu0 }
 0x78a   :  { %3267 = vst [vmem:[#allocation2] sm:$0x3] %v3264_v17 }
 0x78b   :  { %4257 = shalt.err (!%p4254_p4)
}
 0x78c   :  { %s4258_s19 = scalar_lea.hbm %s5276_s14, 32 }
 0x78d   :  { %p4259_p5 = scmp.ne.s32.totalorder %s5276_s14, %s4258_s19  ;;  %p4262_p6 = scmp.lt.u32.totalorder %s4258_s19, %s5276_s14 }
 0x78f   :  { %p4264_p7 = pnand %p4262_p6, %p4259_p5 }
 0x791   :  { %4267 = shalt.err (!%p4264_p7)
}
 0x792   :  { %3277 = dma.vmem_to_hbm [thread:$0]  %s3275_s18, 32, %s5276_s14, [#allocation3]  }
 0x793   :  { %4268 = dma.done.wait [#allocation3], 32  }
 0x794   :  { %4269 = vsyncadd [#allocation3], 4294967264 }
 0x795   :  { %3281 = vsyncpa [#allocation3], 1 }

</bundles_post_ra>
